<compile_context>
chip_gen: v6e
topology: v6e:2x2x1
jax: 0.10.0
libtpu: 0.0.40
codegen_flags: <defaults>
</compile_context>

<pallas_src>
import functools

import jax
import jax.numpy as jnp
from jax.experimental import pallas as pl
from jax.experimental.pallas import tpu as pltpu


_PARAM_ORDER = ("w1", "b1", "w2", "b2", "w3", "b3",
                "w4", "b4", "w5", "b5", "w6", "b6")


# ----------------------------------------------------------------------------
# Fused kernel: whole forward pass for one batch tile.
# ----------------------------------------------------------------------------
def _model4_kernel(x_ref,
                   w1_ref, b1_ref, w2_ref, b2_ref, w3_ref, b3_ref,
                   w4_ref, b4_ref, w5_ref, b5_ref, w6_ref, b6_ref,
                   o_ref):
    # x_ref: (TILE_B, 784) f32.  Weights bf16, biases f32.
    def _layer(h_bf16, w_ref, b_ref):
        acc = jnp.dot(h_bf16, w_ref[...], preferred_element_type=jnp.float32)
        return jnp.maximum(acc + b_ref[...], 0.0)      # bias + ReLU in f32

    h = x_ref[...].astype(jnp.bfloat16)
    h = _layer(h, w1_ref, b1_ref).astype(jnp.bfloat16)   # 16x(linear1+relu): (B, 576)
    h = _layer(h, w2_ref, b2_ref).astype(jnp.bfloat16)   # 16x(linear2+relu): (B, 288)
    h = _layer(h, w3_ref, b3_ref).astype(jnp.bfloat16)   # linear3+relu: (B, 144)
    h = _layer(h, w4_ref, b4_ref).astype(jnp.bfloat16)   # linear4+relu: (B, 72)
    h = _layer(h, w5_ref, b5_ref).astype(jnp.bfloat16)   # linear5+relu: (B, 36)
    z = jnp.dot(h, w6_ref[...], preferred_element_type=jnp.float32) + b6_ref[...]

    # log_softmax along the class dim, fully in f32.
    m = jnp.max(z, axis=-1, keepdims=True)
    lse = m + jnp.log(jnp.sum(jnp.exp(z - m), axis=-1, keepdims=True))
    o_ref[...] = (z - lse).astype(o_ref.dtype)


# ----------------------------------------------------------------------------
# Parameter setup (PyTorch-Linear-style uniform init, stored transposed).
# ----------------------------------------------------------------------------
def _linear_params(key, in_features, out_features):
    kw, kb = jax.random.split(key)
    bound = 1.0 / jnp.sqrt(jnp.float32(in_features))
    w = jax.random.uniform(kw, (in_features, out_features), jnp.float32,
                           minval=-bound, maxval=bound)
    b = jax.random.uniform(kb, (1, out_features), jnp.float32,
                           minval=-bound, maxval=bound)
    return w, b


def make_model4_params(input_size, num_classes, seed=0):
    assert input_size == 28 * 28
    hidden = 36
    half = hidden // 2  # 18
    keys = jax.random.split(jax.random.PRNGKey(seed), 6)
    p = {}
    p["w1"], p["b1"] = _linear_params(keys[0], input_size // 16, hidden)   # 49 -> 36
    p["w2"], p["b2"] = _linear_params(keys[1], hidden, half)               # 36 -> 18
    p["w3"], p["b3"] = _linear_params(keys[2], 16 * half, 8 * half)        # 288 -> 144
    p["w4"], p["b4"] = _linear_params(keys[3], 8 * half, 4 * half)         # 144 -> 72
    p["w5"], p["b5"] = _linear_params(keys[4], 4 * half, 2 * half)         # 72 -> 36
    p["w6"], p["b6"] = _linear_params(keys[5], 2 * half, num_classes)      # 36 -> 10
    return p


def _patch_perm():
    # q(j): position of flat pixel j (= 28*row + col) in the torch.cat patch
    # order (x_11, x_12, x_13, x_14, x_21, ..., x_44; each patch row-major 7x7).
    row = jnp.arange(28)[:, None]
    col = jnp.arange(28)[None, :]
    patch = 4 * (row // 7) + (col // 7)         # patch id in cat order
    local = 7 * (row % 7) + (col % 7)           # position inside the 7x7 patch
    return (49 * patch + local).reshape(-1)     # (784,)


def _block_diag(w, n):
    d_in, d_out = w.shape
    big = jnp.zeros((n * d_in, n * d_out), w.dtype)
    for i in range(n):
        big = big.at[i * d_in:(i + 1) * d_in, i * d_out:(i + 1) * d_out].set(w)
    return big


def expand_params_for_kernel(base):
    """Fold patch split + shared linear1/linear2 into (permuted) block-diag weights."""
    perm = _patch_perm()
    w1_big = _block_diag(base["w1"], 16)[perm, :]          # (784, 576)
    w2_big = _block_diag(base["w2"], 16)                   # (576, 288)
    b1_big = jnp.tile(base["b1"], (1, 16))                 # (1, 576)
    b2_big = jnp.tile(base["b2"], (1, 16))                 # (1, 288)
    return {
        "w1": w1_big.astype(jnp.bfloat16), "b1": b1_big,
        "w2": w2_big.astype(jnp.bfloat16), "b2": b2_big,
        "w3": base["w3"].astype(jnp.bfloat16), "b3": base["b3"],
        "w4": base["w4"].astype(jnp.bfloat16), "b4": base["b4"],
        "w5": base["w5"].astype(jnp.bfloat16), "b5": base["b5"],
        "w6": base["w6"].astype(jnp.bfloat16), "b6": base["b6"],
    }


# ----------------------------------------------------------------------------
# Forward pass
# ----------------------------------------------------------------------------
def _round_up(n, m):
    return ((n + m - 1) // m) * m


def _default_vmem_limit():
    # Generation-aware: <= ~48 MiB on v7x (64 MiB physical VMEM per TC),
    # 64 MiB on v5e/v6e (128 MiB physical).  Conservative fallback if the
    # query is unavailable.
    try:
        cap = int(pltpu.get_tpu_info().vmem_capacity_bytes)
        return int(min(64 * 1024 * 1024, (cap * 3) // 4))
    except Exception:
        return 32 * 1024 * 1024


@functools.partial(jax.jit, static_argnames=("num_classes", "tile_b"))
def model4_forward(x, kparams, num_classes=10, tile_b=1024):
    B, D = x.shape

    # Batch tile: multiple of 8, capped at tile_b, and small enough that the
    # grid has >= 2 steps whenever B > 8 (so v7x's second TensorCore gets work
    # via dimension_semantics=("parallel",)).
    tb = max(8, min(tile_b, _round_up(pl.cdiv(B, 2), 8)))
    grid = (pl.cdiv(B, tb),)   # no wrapper-side pad: the partial last block is
                               # masked by Pallas; rows are independent.

    def resident(shape):
        # Weights/biases: same block every grid step -> loaded once, VMEM-resident.
        return pl.BlockSpec(shape, lambda i: (0, 0))

    in_specs = [pl.BlockSpec((tb, D), lambda i: (i, 0))]
    in_specs += [resident(kparams[name].shape) for name in _PARAM_ORDER]
    out_specs = pl.BlockSpec((tb, num_classes), lambda i: (i, 0))

    flops = 2 * B * (784 * 576 + 576 * 288 + 288 * 144 + 144 * 72
                     + 72 * 36 + 36 * num_classes)
    bytes_accessed = (x.size * x.dtype.itemsize
                      + sum(int(kparams[n].size) * kparams[n].dtype.itemsize
                            for n in _PARAM_ORDER)
                      + B * num_classes * 4)
    cost = pl.CostEstimate(flops=flops,
                           transcendentals=B * (num_classes + 1),
                           bytes_accessed=bytes_accessed)

    out = pl.pallas_call(
        _model4_kernel,
        out_shape=jax.ShapeDtypeStruct((B, num_classes), jnp.float32),
        grid=grid,
        in_specs=in_specs,
        out_specs=out_specs,
        compiler_params=pltpu.CompilerParams(
            dimension_semantics=("parallel",),          # shard batch over v7x's 2 TCs
            vmem_limit_bytes=_default_vmem_limit()),
        cost_estimate=cost,
    )(x, *(kparams[name] for name in _PARAM_ORDER))
    return out


# ----------------------------------------------------------------------------
# Pure-JAX f32 reference (patch-based, matches the PyTorch forward exactly).
# ----------------------------------------------------------------------------
def model4_reference(x, base):
    B = x.shape[0]
    img = x.reshape(B, 28, 28)
    patches = (img.reshape(B, 4, 7, 4, 7)
                  .transpose(0, 1, 3, 2, 4)
                  .reshape(B * 16, 49))                # x_11, x_12, ..., x_44
    h = jnp.maximum(patches @ base["w1"] + base["b1"], 0.0)
    h = jnp.maximum(h @ base["w2"] + base["b2"], 0.0)
    cat = h.reshape(B, 16 * 18)                        # torch.cat(..., dim=1)
    h = jnp.maximum(cat @ base["w3"] + base["b3"], 0.0)
    h = jnp.maximum(h @ base["w4"] + base["b4"], 0.0)
    h = jnp.maximum(h @ base["w5"] + base["b5"], 0.0)
    z = h @ base["w6"] + base["b6"]
    return jax.nn.log_softmax(z, axis=-1)


# TODO(synk): nn.Dropout and nn.NLLLoss are defined in __init__ but never used
# in forward(); they are intentionally not implemented.

if __name__ == "__main__":
    input_size = 28 * 28   # 784
    num_classes = 10

    base_params = make_model4_params(input_size, num_classes, seed=0)
    kernel_params = expand_params_for_kernel(base_params)

    # Primary small test (matches the spec's tiny-shape requirement).
    batch = 2
    x = jax.random.normal(jax.random.PRNGKey(0), (batch, input_size),
                          dtype=jnp.float32)
    out = jax.block_until_ready(model4_forward(x, kernel_params,
                                               num_classes=num_classes))
    assert out.shape == (batch, num_classes)
    # log_softmax rows should exponentiate-and-sum to ~1
    assert bool(jnp.allclose(jnp.sum(jnp.exp(out), axis=-1), 1.0, atol=1e-4))
    ref = model4_reference(x, base_params)
    max_err = float(jnp.max(jnp.abs(out - ref)))
    assert max_err < 5e-2, f"max abs err vs f32 reference: {max_err}"

    # Secondary test: non-divisible batch exercises the no-pad partial-block
    # path and a multi-step ("parallel") grid.
    batch2 = 37
    x2 = jax.random.normal(jax.random.PRNGKey(1), (batch2, input_size),
                           dtype=jnp.float32)
    out2 = jax.block_until_ready(model4_forward(x2, kernel_params,
                                                num_classes=num_classes))
    assert out2.shape == (batch2, num_classes)
    ref2 = model4_reference(x2, base_params)
    max_err2 = float(jnp.max(jnp.abs(out2 - ref2)))
    assert max_err2 < 5e-2, f"max abs err vs f32 reference (B=37): {max_err2}"

    print("KERNEL_OK")
</pallas_src>

<mosaic_0001>
module attributes {stable_mosaic.version = 11 : i64} {
  func.func @_model4_kernel(%arg0: i32, %arg1: memref<8x784xf32, #tpu.memory_space<vmem>>, %arg2: memref<784x576xbf16, #tpu.memory_space<vmem>>, %arg3: memref<1x576xf32, #tpu.memory_space<vmem>>, %arg4: memref<576x288xbf16, #tpu.memory_space<vmem>>, %arg5: memref<1x288xf32, #tpu.memory_space<vmem>>, %arg6: memref<288x144xbf16, #tpu.memory_space<vmem>>, %arg7: memref<1x144xf32, #tpu.memory_space<vmem>>, %arg8: memref<144x72xbf16, #tpu.memory_space<vmem>>, %arg9: memref<1x72xf32, #tpu.memory_space<vmem>>, %arg10: memref<72x36xbf16, #tpu.memory_space<vmem>>, %arg11: memref<1x36xf32, #tpu.memory_space<vmem>>, %arg12: memref<36x10xbf16, #tpu.memory_space<vmem>>, %arg13: memref<1x10xf32, #tpu.memory_space<vmem>>, %arg14: memref<8x10xf32, #tpu.memory_space<vmem>>) attributes {dimension_semantics = [#tpu.dimension_semantics<parallel>], iteration_bounds = array<i64: 1>, scalar_prefetch = 0 : i64, scratch_operands = 0 : i64, tpu.core_type = #tpu.core_type<tc>, window_params = [{transform_indices = @transform_0, window_bounds = array<i64: 8, 784>}, {pipeline_mode = #tpu.pipeline_mode<synchronous>, transform_indices = @transform_1, window_bounds = array<i64: 784, 576>}, {pipeline_mode = #tpu.pipeline_mode<synchronous>, transform_indices = @transform_2, window_bounds = array<i64: 1, 576>}, {pipeline_mode = #tpu.pipeline_mode<synchronous>, transform_indices = @transform_3, window_bounds = array<i64: 576, 288>}, {pipeline_mode = #tpu.pipeline_mode<synchronous>, transform_indices = @transform_4, window_bounds = array<i64: 1, 288>}, {pipeline_mode = #tpu.pipeline_mode<synchronous>, transform_indices = @transform_5, window_bounds = array<i64: 288, 144>}, {pipeline_mode = #tpu.pipeline_mode<synchronous>, transform_indices = @transform_6, window_bounds = array<i64: 1, 144>}, {pipeline_mode = #tpu.pipeline_mode<synchronous>, transform_indices = @transform_7, window_bounds = array<i64: 144, 72>}, {pipeline_mode = #tpu.pipeline_mode<synchronous>, transform_indices = @transform_8, window_bounds = array<i64: 1, 72>}, {pipeline_mode = #tpu.pipeline_mode<synchronous>, transform_indices = @transform_9, window_bounds = array<i64: 72, 36>}, {pipeline_mode = #tpu.pipeline_mode<synchronous>, transform_indices = @transform_10, window_bounds = array<i64: 1, 36>}, {pipeline_mode = #tpu.pipeline_mode<synchronous>, transform_indices = @transform_11, window_bounds = array<i64: 36, 10>}, {pipeline_mode = #tpu.pipeline_mode<synchronous>, transform_indices = @transform_12, window_bounds = array<i64: 1, 10>}, {transform_indices = @transform_13, window_bounds = array<i64: 8, 10>}]} {
    %c0 = arith.constant 0 : index
    %c0_0 = arith.constant 0 : index
    %0 = vector.load %arg1[%c0, %c0_0] : memref<8x784xf32, #tpu.memory_space<vmem>>, vector<8x784xf32>
    %1 = arith.truncf %0 : vector<8x784xf32> to vector<8x784xbf16>
    %c0_1 = arith.constant 0 : index
    %c0_2 = arith.constant 0 : index
    %2 = vector.load %arg2[%c0_1, %c0_2] : memref<784x576xbf16, #tpu.memory_space<vmem>>, vector<784x576xbf16>
    %cst = arith.constant dense<0.000000e+00> : vector<8x576xf32>
    %3 = tpu.matmul %1, %2, %cst {dimension_numbers = #tpu.dot_dimension_numbers<[1], [0], [0], [1], [0, 0, 1, 1], [], []>} : vector<8x784xbf16>, vector<784x576xbf16>, vector<8x576xf32> -> vector<8x576xf32>
    %c0_3 = arith.constant 0 : index
    %c0_4 = arith.constant 0 : index
    %4 = vector.load %arg3[%c0_3, %c0_4] : memref<1x576xf32, #tpu.memory_space<vmem>>, vector<1x576xf32>
    %5 = vector.broadcast %4 : vector<1x576xf32> to vector<8x576xf32>
    %6 = arith.addf %3, %5 : vector<8x576xf32>
    %cst_5 = arith.constant 0.000000e+00 : f32
    %7 = vector.broadcast %cst_5 : f32 to vector<8x576xf32>
    %8 = arith.maximumf %6, %7 : vector<8x576xf32>
    %9 = arith.truncf %8 : vector<8x576xf32> to vector<8x576xbf16>
    %c0_6 = arith.constant 0 : index
    %c0_7 = arith.constant 0 : index
    %10 = vector.load %arg4[%c0_6, %c0_7] : memref<576x288xbf16, #tpu.memory_space<vmem>>, vector<576x288xbf16>
    %cst_8 = arith.constant dense<0.000000e+00> : vector<8x288xf32>
    %11 = tpu.matmul %9, %10, %cst_8 {dimension_numbers = #tpu.dot_dimension_numbers<[1], [0], [0], [1], [0, 0, 1, 1], [], []>} : vector<8x576xbf16>, vector<576x288xbf16>, vector<8x288xf32> -> vector<8x288xf32>
    %c0_9 = arith.constant 0 : index
    %c0_10 = arith.constant 0 : index
    %12 = vector.load %arg5[%c0_9, %c0_10] : memref<1x288xf32, #tpu.memory_space<vmem>>, vector<1x288xf32>
    %13 = vector.broadcast %12 : vector<1x288xf32> to vector<8x288xf32>
    %14 = arith.addf %11, %13 : vector<8x288xf32>
    %cst_11 = arith.constant 0.000000e+00 : f32
    %15 = vector.broadcast %cst_11 : f32 to vector<8x288xf32>
    %16 = arith.maximumf %14, %15 : vector<8x288xf32>
    %17 = arith.truncf %16 : vector<8x288xf32> to vector<8x288xbf16>
    %c0_12 = arith.constant 0 : index
    %c0_13 = arith.constant 0 : index
    %18 = vector.load %arg6[%c0_12, %c0_13] : memref<288x144xbf16, #tpu.memory_space<vmem>>, vector<288x144xbf16>
    %cst_14 = arith.constant dense<0.000000e+00> : vector<8x144xf32>
    %19 = tpu.matmul %17, %18, %cst_14 {dimension_numbers = #tpu.dot_dimension_numbers<[1], [0], [0], [1], [0, 0, 1, 1], [], []>} : vector<8x288xbf16>, vector<288x144xbf16>, vector<8x144xf32> -> vector<8x144xf32>
    %c0_15 = arith.constant 0 : index
    %c0_16 = arith.constant 0 : index
    %20 = vector.load %arg7[%c0_15, %c0_16] : memref<1x144xf32, #tpu.memory_space<vmem>>, vector<1x144xf32>
    %21 = vector.broadcast %20 : vector<1x144xf32> to vector<8x144xf32>
    %22 = arith.addf %19, %21 : vector<8x144xf32>
    %cst_17 = arith.constant 0.000000e+00 : f32
    %23 = vector.broadcast %cst_17 : f32 to vector<8x144xf32>
    %24 = arith.maximumf %22, %23 : vector<8x144xf32>
    %25 = arith.truncf %24 : vector<8x144xf32> to vector<8x144xbf16>
    %c0_18 = arith.constant 0 : index
    %c0_19 = arith.constant 0 : index
    %26 = vector.load %arg8[%c0_18, %c0_19] : memref<144x72xbf16, #tpu.memory_space<vmem>>, vector<144x72xbf16>
    %cst_20 = arith.constant dense<0.000000e+00> : vector<8x72xf32>
    %27 = tpu.matmul %25, %26, %cst_20 {dimension_numbers = #tpu.dot_dimension_numbers<[1], [0], [0], [1], [0, 0, 1, 1], [], []>} : vector<8x144xbf16>, vector<144x72xbf16>, vector<8x72xf32> -> vector<8x72xf32>
    %c0_21 = arith.constant 0 : index
    %c0_22 = arith.constant 0 : index
    %28 = vector.load %arg9[%c0_21, %c0_22] : memref<1x72xf32, #tpu.memory_space<vmem>>, vector<1x72xf32>
    %29 = vector.broadcast %28 : vector<1x72xf32> to vector<8x72xf32>
    %30 = arith.addf %27, %29 : vector<8x72xf32>
    %cst_23 = arith.constant 0.000000e+00 : f32
    %31 = vector.broadcast %cst_23 : f32 to vector<8x72xf32>
    %32 = arith.maximumf %30, %31 : vector<8x72xf32>
    %33 = arith.truncf %32 : vector<8x72xf32> to vector<8x72xbf16>
    %c0_24 = arith.constant 0 : index
    %c0_25 = arith.constant 0 : index
    %34 = vector.load %arg10[%c0_24, %c0_25] : memref<72x36xbf16, #tpu.memory_space<vmem>>, vector<72x36xbf16>
    %cst_26 = arith.constant dense<0.000000e+00> : vector<8x36xf32>
    %35 = tpu.matmul %33, %34, %cst_26 {dimension_numbers = #tpu.dot_dimension_numbers<[1], [0], [0], [1], [0, 0, 1, 1], [], []>} : vector<8x72xbf16>, vector<72x36xbf16>, vector<8x36xf32> -> vector<8x36xf32>
    %c0_27 = arith.constant 0 : index
    %c0_28 = arith.constant 0 : index
    %36 = vector.load %arg11[%c0_27, %c0_28] : memref<1x36xf32, #tpu.memory_space<vmem>>, vector<1x36xf32>
    %37 = vector.broadcast %36 : vector<1x36xf32> to vector<8x36xf32>
    %38 = arith.addf %35, %37 : vector<8x36xf32>
    %cst_29 = arith.constant 0.000000e+00 : f32
    %39 = vector.broadcast %cst_29 : f32 to vector<8x36xf32>
    %40 = arith.maximumf %38, %39 : vector<8x36xf32>
    %41 = arith.truncf %40 : vector<8x36xf32> to vector<8x36xbf16>
    %c0_30 = arith.constant 0 : index
    %c0_31 = arith.constant 0 : index
    %42 = vector.load %arg12[%c0_30, %c0_31] : memref<36x10xbf16, #tpu.memory_space<vmem>>, vector<36x10xbf16>
    %cst_32 = arith.constant dense<0.000000e+00> : vector<8x10xf32>
    %43 = tpu.matmul %41, %42, %cst_32 {dimension_numbers = #tpu.dot_dimension_numbers<[1], [0], [0], [1], [0, 0, 1, 1], [], []>} : vector<8x36xbf16>, vector<36x10xbf16>, vector<8x10xf32> -> vector<8x10xf32>
    %c0_33 = arith.constant 0 : index
    %c0_34 = arith.constant 0 : index
    %44 = vector.load %arg13[%c0_33, %c0_34] : memref<1x10xf32, #tpu.memory_space<vmem>>, vector<1x10xf32>
    %45 = vector.broadcast %44 : vector<1x10xf32> to vector<8x10xf32>
    %46 = arith.addf %43, %45 : vector<8x10xf32>
    %cst_35 = arith.constant dense<0xFF800000> : vector<8xf32>
    %47 = vector.multi_reduction <maximumf>, %46, %cst_35 [1] : vector<8x10xf32> to vector<8xf32>
    %48 = vector.shape_cast %47 : vector<8xf32> to vector<8x1xf32>
    %49 = vector.broadcast %48 : vector<8x1xf32> to vector<8x10xf32>
    %50 = arith.subf %46, %49 : vector<8x10xf32>
    %51 = math.exp %50 : vector<8x10xf32>
    %cst_36 = arith.constant dense<0.000000e+00> : vector<8xf32>
    %52 = vector.multi_reduction <add>, %51, %cst_36 [1] : vector<8x10xf32> to vector<8xf32>
    %53 = vector.shape_cast %52 : vector<8xf32> to vector<8x1xf32>
    %54 = math.log %53 : vector<8x1xf32>
    %55 = arith.addf %48, %54 : vector<8x1xf32>
    %56 = vector.broadcast %55 : vector<8x1xf32> to vector<8x10xf32>
    %57 = arith.subf %46, %56 : vector<8x10xf32>
    %c0_37 = arith.constant 0 : index
    %c0_38 = arith.constant 0 : index
    %58 = vector.load %arg14[%c0_37, %c0_38] : memref<8x10xf32, #tpu.memory_space<vmem>>, vector<8x10xf32>
    tpu.vector_store %arg14[%c0_37, %c0_38], %57 {strides = array<i32>} : memref<8x10xf32, #tpu.memory_space<vmem>>, vector<8x10xf32>,
    return
  }
  func.func @transform_0(%arg0: i32) -> (i32, i32) {
    %c0_i32 = arith.constant 0 : i32
    %c0_i32_0 = arith.constant 0 : i32
    return %arg0, %c0_i32 : i32, i32
  }
  func.func @transform_1(%arg0: i32) -> (i32, i32) {
    %c0_i32 = arith.constant 0 : i32
    %c0_i32_0 = arith.constant 0 : i32
    %c0_i32_1 = arith.constant 0 : i32
    return %c0_i32, %c0_i32_0 : i32, i32
  }
  func.func @transform_2(%arg0: i32) -> (i32, i32) {
    %c0_i32 = arith.constant 0 : i32
    %c0_i32_0 = arith.constant 0 : i32
    %c0_i32_1 = arith.constant 0 : i32
    return %c0_i32, %c0_i32_0 : i32, i32
  }
  func.func @transform_3(%arg0: i32) -> (i32, i32) {
    %c0_i32 = arith.constant 0 : i32
    %c0_i32_0 = arith.constant 0 : i32
    %c0_i32_1 = arith.constant 0 : i32
    return %c0_i32, %c0_i32_0 : i32, i32
  }
  func.func @transform_4(%arg0: i32) -> (i32, i32) {
    %c0_i32 = arith.constant 0 : i32
    %c0_i32_0 = arith.constant 0 : i32
    %c0_i32_1 = arith.constant 0 : i32
    return %c0_i32, %c0_i32_0 : i32, i32
  }
  func.func @transform_5(%arg0: i32) -> (i32, i32) {
    %c0_i32 = arith.constant 0 : i32
    %c0_i32_0 = arith.constant 0 : i32
    %c0_i32_1 = arith.constant 0 : i32
    return %c0_i32, %c0_i32_0 : i32, i32
  }
  func.func @transform_6(%arg0: i32) -> (i32, i32) {
    %c0_i32 = arith.constant 0 : i32
    %c0_i32_0 = arith.constant 0 : i32
    %c0_i32_1 = arith.constant 0 : i32
    return %c0_i32, %c0_i32_0 : i32, i32
  }
  func.func @transform_7(%arg0: i32) -> (i32, i32) {
    %c0_i32 = arith.constant 0 : i32
    %c0_i32_0 = arith.constant 0 : i32
    %c0_i32_1 = arith.constant 0 : i32
    return %c0_i32, %c0_i32_0 : i32, i32
  }
  func.func @transform_8(%arg0: i32) -> (i32, i32) {
    %c0_i32 = arith.constant 0 : i32
    %c0_i32_0 = arith.constant 0 : i32
    %c0_i32_1 = arith.constant 0 : i32
    return %c0_i32, %c0_i32_0 : i32, i32
  }
  func.func @transform_9(%arg0: i32) -> (i32, i32) {
    %c0_i32 = arith.constant 0 : i32
    %c0_i32_0 = arith.constant 0 : i32
    %c0_i32_1 = arith.constant 0 : i32
    return %c0_i32, %c0_i32_0 : i32, i32
  }
  func.func @transform_10(%arg0: i32) -> (i32, i32) {
    %c0_i32 = arith.constant 0 : i32
    %c0_i32_0 = arith.constant 0 : i32
    %c0_i32_1 = arith.constant 0 : i32
    return %c0_i32, %c0_i32_0 : i32, i32
  }
  func.func @transform_11(%arg0: i32) -> (i32, i32) {
    %c0_i32 = arith.constant 0 : i32
    %c0_i32_0 = arith.constant 0 : i32
    %c0_i32_1 = arith.constant 0 : i32
    return %c0_i32, %c0_i32_0 : i32, i32
  }
  func.func @transform_12(%arg0: i32) -> (i32, i32) {
    %c0_i32 = arith.constant 0 : i32
    %c0_i32_0 = arith.constant 0 : i32
    %c0_i32_1 = arith.constant 0 : i32
    return %c0_i32, %c0_i32_0 : i32, i32
  }
  func.func @transform_13(%arg0: i32) -> (i32, i32) {
    %c0_i32 = arith.constant 0 : i32
    %c0_i32_0 = arith.constant 0 : i32
    return %arg0, %c0_i32 : i32, i32
  }
}

</mosaic_0001>

<bundles_post_ra>
// kernel: model4_forward.1
= control target key start
LH: loop header
LB: loop body
LE: loop exit
PB: predicated region body
PF: predicated region fallthrough
CT: control target
= control target key end

     0   :  { %18 = vsyncpa [#allocation3], 0  ;;  %v5065_v38 = vmov 1983009808   ;;  %v69_v40 = vlaneseq  ;;  %vm1742_vm0 = vcmask 130048   ;;  %vm5068_vm1 = vmmov 0   ;;  %s6560_s0 = inlined_call_operand.vmem [shape: f32[2,784], index: 0, kind: input, shape index: {}]   ;;  %s6561_s1 = inlined_call_operand.vmem [shape: bf16[784,576], index: 1, kind: input, shape index: {}]   ;;  %s6562_s2 = inlined_call_operand.vmem [shape: f32[1,576], index: 2, kind: input, shape index: {}]   ;;  %s6563_s3 = inlined_call_operand.vmem [shape: bf16[576,288], index: 3, kind: input, shape index: {}]   ;;  %s6564_s4 = inlined_call_operand.vmem [shape: f32[1,288], index: 4, kind: input, shape index: {}]   ;;  %s6565_s5 = inlined_call_operand.vmem [shape: bf16[288,144], index: 5, kind: input, shape index: {}]   ;;  %s6566_s6 = inlined_call_operand.vmem [shape: f32[1,144], index: 6, kind: input, shape index: {}]   ;;  %s6567_s7 = inlined_call_operand.vmem [shape: bf16[144,72], index: 7, kind: input, shape index: {}]   ;;  %s6568_s8 = inlined_call_operand.vmem [shape: f32[1,72], index: 8, kind: input, shape index: {}]   ;;  %s6569_s9 = inlined_call_operand.vmem [shape: bf16[72,36], index: 9, kind: input, shape index: {}]   ;;  %s6570_s10 = inlined_call_operand.vmem [shape: f32[1,36], index: 10, kind: input, shape index: {}]   ;;  %s6571_s11 = inlined_call_operand.vmem [shape: bf16[36,10], index: 11, kind: input, shape index: {}]   ;;  %s6572_s12 = inlined_call_operand.vmem [shape: f32[1,10], index: 12, kind: input, shape index: {}]   ;;  %s6573_s13 = inlined_call_operand.hbm [shape: f32[2,10], index: 13, kind: output, shape index: {}]  }
   0x1   :  { %v4469_v0 = vld [vmem:[%s6561_s1 + $0x11c] ss:$20 sps:$4 sm:$0xff]   ;;  %v4473_v2 = vld [vmem:[%s6561_s1 + $0x118] ss:$20 sps:$4 sm:$0xff]   ;;  %v4475_v4 = vld [vmem:[%s6561_s1 + $0xf4] ss:$20 sps:$4 sm:$0xff]   ;;  %v67_v39 = vunpack.c.l.s4 %v5065_v38 }
   0x2   :  { %v4471_v1 = vld [vmem:[%s6561_s1 + $0x39c] ss:$20 sps:$4 sm:$0xff]   ;;  %v4474_v3 = vld [vmem:[%s6561_s1 + $0x398] ss:$20 sps:$4 sm:$0xff]   ;;  %1746 = vmatprep.subr.bf16.mxu0 %v4469_v0  ;;  %v4477_v5 = vld [vmem:[%s6561_s1 + $0x374] ss:$20 sps:$4 sm:$0xff]  }
   0x3   :  { %1787 = vmatprep.subr.bf16.mxu1 %v4471_v1  ;;  %1747 = vmatpush1.bf16.msra.mxu0 %v4473_v2  ;;  %v4479_v6 = vld [vmem:[%s6561_s1 + $0xf0] ss:$20 sps:$4 sm:$0xff]   ;;  %v4481_v8 = vld [vmem:[%s6561_s1 + $0xcc] ss:$20 sps:$4 sm:$0xff]   ;;  %v4485_v10 = vld [vmem:[%s6561_s1 + $0xc8] ss:$20 sps:$4 sm:$0xff]   ;;  %v68_v45 = vunpack.c.0.s8 %v67_v39 }
   0x4   :  { %1788 = vmatpush1.bf16.msra.mxu1 %v4474_v3  ;;  %1748 = vmatprep.subr.bf16.mxu0 %v4475_v4  ;;  %v4480_v7 = vld [vmem:[%s6561_s1 + $0x370] ss:$20 sps:$4 sm:$0xff]   ;;  %v4483_v9 = vld [vmem:[%s6561_s1 + $0x34c] ss:$20 sps:$4 sm:$0xff]   ;;  %v4486_v11 = vld [vmem:[%s6561_s1 + $0x348] ss:$20 sps:$4 sm:$0xff]  }
   0x5   :  { %1789 = vmatprep.subr.bf16.mxu1 %v4477_v5  ;;  %v4487_v12 = vld [vmem:[%s6561_s1 + $0xa4] ss:$20 sps:$4 sm:$0xff]   ;;  %v4491_v14 = vld [vmem:[%s6561_s1 + $0xa0] ss:$20 sps:$4 sm:$0xff]   ;;  %v4493_v16 = vld [vmem:[%s6561_s1 + $0x7c] ss:$20 sps:$4 sm:$0xff]  }
   0x6   :  { %v4489_v13 = vld [vmem:[%s6561_s1 + $0x324] ss:$20 sps:$4 sm:$0xff]   ;;  %v4492_v15 = vld [vmem:[%s6561_s1 + $0x320] ss:$20 sps:$4 sm:$0xff]   ;;  %v4495_v17 = vld [vmem:[%s6561_s1 + $0x2fc] ss:$20 sps:$4 sm:$0xff]  }
   0x7   :  { %1749 = vmatpush1.bf16.msra.mxu0 %v4479_v6  ;;  %v4497_v18 = vld [vmem:[%s6561_s1 + $0x78] ss:$20 sps:$4 sm:$0xff]   ;;  %v4499_v20 = vld [vmem:[%s6561_s1 + $0x54] ss:$20 sps:$4 sm:$0xff]   ;;  %v4503_v22 = vld [vmem:[%s6561_s1 + $0x50] ss:$20 sps:$4 sm:$0xff]  }
   0x8   :  { %1790 = vmatpush1.bf16.msra.mxu1 %v4480_v7  ;;  %1750 = vmatprep.subr.bf16.mxu0 %v4481_v8  ;;  %v4498_v19 = vld [vmem:[%s6561_s1 + $0x2f8] ss:$20 sps:$4 sm:$0xff]   ;;  %v4501_v21 = vld [vmem:[%s6561_s1 + $0x2d4] ss:$20 sps:$4 sm:$0xff]   ;;  %v4504_v23 = vld [vmem:[%s6561_s1 + $0x2d0] ss:$20 sps:$4 sm:$0xff]  }
   0x9   :  { %1791 = vmatprep.subr.bf16.mxu1 %v4483_v9  ;;  %v4505_v24 = vld [vmem:[%s6561_s1 + $0x2c] ss:$20 sps:$4 sm:$0xff]   ;;  %v4509_v26 = vld [vmem:[%s6561_s1 + $0x28] ss:$20 sps:$4 sm:$0xff]   ;;  %v4511_v28 = vld [vmem:[%s6561_s1 + $0x4] ss:$20 sps:$4 sm:$0xff]  }
   0xa   :  { %v4507_v25 = vld [vmem:[%s6561_s1 + $0x2ac] ss:$20 sps:$4 sm:$0xff]   ;;  %v4510_v27 = vld [vmem:[%s6561_s1 + $0x2a8] ss:$20 sps:$4 sm:$0xff]   ;;  %v4513_v29 = vld [vmem:[%s6561_s1 + $0x284] ss:$20 sps:$4 sm:$0xff]  }
   0xb   :  { %1751 = vmatpush1.bf16.msra.mxu0 %v4485_v10  ;;  %v4515_v30 = vld [vmem:[%s6561_s1] ss:$20 sps:$4 sm:$0xff]   ;;  %v4517_v32 = vld [vmem:[%s6561_s1 + $0x25c] ss:$20 sps:$4 sm:$0xff]   ;;  %v4521_v34 = vld [vmem:[%s6561_s1 + $0x258] ss:$20 sps:$4 sm:$0xff]  }
   0xc   :  { %1792 = vmatpush1.bf16.msra.mxu1 %v4486_v11  ;;  %1752 = vmatprep.subr.bf16.mxu0 %v4487_v12  ;;  %v4516_v31 = vld [vmem:[%s6561_s1 + $0x280] ss:$20 sps:$4 sm:$0xff]   ;;  %v4519_v33 = vld [vmem:[%s6561_s1 + $0x4dc] ss:$20 sps:$4 sm:$0xff]   ;;  %v4522_v35 = vld [vmem:[%s6561_s1 + $0x4d8] ss:$20 sps:$4 sm:$0xff]  }
   0xd   :  { %1793 = vmatprep.subr.bf16.mxu1 %v4489_v13  ;;  %v4523_v36 = vld [vmem:[%s6561_s1 + $0x234] ss:$20 sps:$4 sm:$0xff]   ;;  %v4527_v41 = vld [vmem:[%s6561_s1 + $0x230] ss:$20 sps:$4 sm:$0xff]   ;;  %v4529_v43 = vld [vmem:[%s6561_s1 + $0x20c] ss:$20 sps:$4 sm:$0xff]  }
   0xe   :  { %v4525_v37 = vld [vmem:[%s6561_s1 + $0x4b4] ss:$20 sps:$4 sm:$0xff]   ;;  %v4528_v42 = vld [vmem:[%s6561_s1 + $0x4b0] ss:$20 sps:$4 sm:$0xff]   ;;  %v4531_v44 = vld [vmem:[%s6561_s1 + $0x48c] ss:$20 sps:$4 sm:$0xff]  }
   0xf   :  { %1753 = vmatpush1.bf16.msra.mxu0 %v4491_v14  ;;  %v5268_v46 = vshrl.u32 %v69_v40, 7  ;;  %v4533_v47 = vld [vmem:[%s6561_s1 + $0x208] ss:$20 sps:$4 sm:$0xff]   ;;  %v4535_v49 = vld [vmem:[%s6561_s1 + $0x1e4] ss:$20 sps:$4 sm:$0xff]   ;;  %vm2981_vm2 = vcmask 523264  }
  0x10   :  { %1794 = vmatpush1.bf16.msra.mxu1 %v4492_v15  ;;  %1754 = vmatprep.subr.bf16.mxu0 %v4493_v16  ;;  %v4534_v48 = vld [vmem:[%s6561_s1 + $0x488] ss:$20 sps:$4 sm:$0xff]   ;;  %v4537_v50 = vld [vmem:[%s6561_s1 + $0x464] ss:$20 sps:$4 sm:$0xff]   ;;  %v4539_v51 = vld [vmem:[%s6561_s1 + $0x1e0] ss:$20 sps:$4 sm:$0xff]  }
  0x11   :  { %1795 = vmatprep.subr.bf16.mxu1 %v4495_v17  ;;  %v5286_v52 = vsub.s32 %v68_v45, %v5268_v46  ;;  %v4540_v53 = vld [vmem:[%s6561_s1 + $0x460] ss:$20 sps:$4 sm:$0xff]   ;;  %v4541_v54 = vld [vmem:[%s6561_s1 + $0x1bc] ss:$20 sps:$4 sm:$0xff]   ;;  %v4545_v0 = vld [vmem:[%s6561_s1 + $0x1b8] ss:$20 sps:$4 sm:$0xff]  }
  0x12   :  { %v4565_v55 = vld [vmem:[%s6560_s0] ss:$14 sps:$4 sm:$0xff]   ;;  %v4567_v56 = vld [vmem:[%s6560_s0 + $0x1c] ss:$14 sps:$4 sm:$0xff]   ;;  %v4569_v57 = vld [vmem:[%s6560_s0 + $0x4] ss:$14 sps:$4 sm:$0xff]  }
  0x13   :  { %1755 = vmatpush1.bf16.msra.mxu0 %v4497_v18  ;;  %v4570_v58 = vld [vmem:[%s6560_s0 + $0x20] ss:$14 sps:$4 sm:$0xff]   ;;  %v72_v60 = vrot.slane %v4565_v55, %v5286_v52  ;;  %v86_v61 = vrot.slane %v4567_v56, %v5286_v52  ;;  %v79_v62 = vrot.slane %v4569_v57, %v5286_v52  ;;  %v4547_v3 = vld [vmem:[%s6561_s1 + $0x194] ss:$20 sps:$4 sm:$0xff]   ;;  %v4559_v14 = vld [vmem:[%s6561_s1 + $0x144] ss:$20 sps:$4 sm:$0xff]  }
  0x14   :  { %1796 = vmatpush1.bf16.msra.mxu1 %v4498_v19  ;;  %1756 = vmatprep.subr.bf16.mxu0 %v4499_v20  ;;  %v4543_v59 = vld [vmem:[%s6561_s1 + $0x43c] ss:$20 sps:$4 sm:$0xff]   ;;  %v93_v63 = vrot.slane %v4570_v58, %v5286_v52  ;;  %v4546_v2 = vld [vmem:[%s6561_s1 + $0x438] ss:$20 sps:$4 sm:$0xff]   ;;  %v4549_v5 = vld [vmem:[%s6561_s1 + $0x414] ss:$20 sps:$4 sm:$0xff]  }
  0x15   :  { %1797 = vmatprep.subr.bf16.mxu1 %v4501_v21  ;;  %v95_v1 = vcombine.high %v72_v60, %v86_v61  ;;  %v4551_v6 = vld [vmem:[%s6561_s1 + $0x190] ss:$20 sps:$4 sm:$0xff]   ;;  %v4553_v10 = vld [vmem:[%s6561_s1 + $0x16c] ss:$20 sps:$4 sm:$0xff]   ;;  %v4557_v12 = vld [vmem:[%s6561_s1 + $0x168] ss:$20 sps:$4 sm:$0xff]   ;;  %v94_v18 = vcombine.low %v72_v60, %v86_v61 }
  0x16   :  { %v97_v4 = vcombine.high %v79_v62, %v93_v63  ;;  %v4552_v8 = vld [vmem:[%s6561_s1 + $0x410] ss:$20 sps:$4 sm:$0xff]   ;;  %v4555_v11 = vld [vmem:[%s6561_s1 + $0x3ec] ss:$20 sps:$4 sm:$0xff]   ;;  %v4558_v13 = vld [vmem:[%s6561_s1 + $0x3e8] ss:$20 sps:$4 sm:$0xff]   ;;  %v96_v20 = vcombine.low %v79_v62, %v93_v63 }
  0x17   :  { %1757 = vmatpush1.bf16.msra.mxu0 %v4503_v22  ;;  %v5328_v7 = vpack.c.bf16 %v95_v1, %v95_v1  ;;  %v4561_v15 = vld [vmem:[%s6561_s1 + $0x3c4] ss:$20 sps:$4 sm:$0xff]   ;;  %v4563_v16 = vld [vmem:[%s6561_s1 + $0x140] ss:$20 sps:$4 sm:$0xff]   ;;  %v4573_v22 = vld [vmem:[%s6561_s1 + $0x61c] ss:$20 sps:$4 sm:$0xff]  }
  0x18   :  { %1798 = vmatpush1.bf16.msra.mxu1 %v4504_v23  ;;  %1758 = vmatprep.subr.bf16.mxu0 %v4505_v24  ;;  %v5333_v9 = vpack.c.bf16 %v97_v4, %v97_v4  ;;  %v4564_v17 = vld [vmem:[%s6561_s1 + $0x3c0] ss:$20 sps:$4 sm:$0xff]   ;;  %v4586_v19 = vld [vmem:[%s6560_s0 + $0xc] ss:$14 sps:$4 sm:$0x33]   ;;  %v5373_v24 = vpack.c.bf16 %v94_v18, %v94_v18  ;;  %vm3462_vm3 = vcmask 261120  }
  0x19   :  { %1799 = vmatprep.subr.bf16.mxu1 %v4507_v25  ;;  %1778 = vmatprep.mubr.bf16.mxu0 %v5328_v7  ;;  %v4588_v21 = vld [vmem:[%s6560_s0 + $0x28] ss:$14 sps:$4 sm:$0x33]   ;;  %v4576_v23 = vld [vmem:[%s6561_s1 + $0x784] ss:$20 sps:$4 sm:$0xff]   ;;  %vm3723_vm4 = vcmask 1043456  }
  0x1a   :  { %1819 = vmatprep.mubr.bf16.mxu1 %v5333_v9  ;;  %v4571_v25 = vld [vmem:[%s6561_s1 + $0x618] ss:$20 sps:$4 sm:$0xff]   ;;  %v4592_v40 = vld [vmem:[%s6561_s1 + $0xfc] ss:$20 sps:$4 sm:$0xff]   ;;  %v4608_v55 = vld [vmem:[%s6561_s1 + $0x80] ss:$20 sps:$4 sm:$0xff]  }
  0x1b   :  { %1759 = vmatpush1.bf16.msra.mxu0 %v4509_v26  ;;  %v5378_v26 = vpack.c.bf16 %v96_v20, %v96_v20  ;;  %v4595_v39 = vld [vmem:[%s6561_s1 + $0x5a4] ss:$20 sps:$4 sm:$0xff]   ;;  %v4611_v56 = vld [vmem:[%s6561_s1 + $0x528] ss:$20 sps:$4 sm:$0xff]   ;;  %v4617_v63 = vld [vmem:[%s6561_s1 + $0x500] ss:$20 sps:$4 sm:$0xff]  }
  0x1c   :  { %1800 = vmatpush1.bf16.msra.mxu1 %v4510_v27  ;;  %1760 = vmatprep.subr.bf16.mxu0 %v4511_v28  ;;  %v4574_v27 = vld [vmem:[%s6561_s1 + $0x780] ss:$20 sps:$4 sm:$0xff]   ;;  %v115_v28 = vrot.slane %v4586_v19, %v5286_v52  ;;  %v4596_v45 = vld [vmem:[%s6561_s1 + $0xd0] ss:$20 sps:$4 sm:$0xff]   ;;  %v4623_v4 = vld [vmem:[%s6561_s1 + $0x758] ss:$20 sps:$4 sm:$0xff]  }
  0x1d   :  { %1801 = vmatprep.subr.bf16.mxu1 %v4513_v29  ;;  %v129_v29 = vrot.slane %v4588_v21, %v5286_v52  ;;  %v4619_v57 = vld [vmem:[%s6561_s1 + $0x504] ss:$20 sps:$4 sm:$0xff]   ;;  %v4616_v60 = vld [vmem:[%s6561_s1 + $0x5c] ss:$20 sps:$4 sm:$0xff]   ;;  %v4641_v18 = vld [vmem:[%s6561_s1 + $0x6e0] ss:$20 sps:$4 sm:$0xff]  }
  0x1e   :  { %v4668_v58 = vld [vmem:[%s6560_s0 + $0x8] ss:$14 sps:$4 sm:$0xff]   ;;  %v4625_v1 = vld [vmem:[%s6561_s1 + $0x75c] ss:$20 sps:$4 sm:$0xff]   ;;  %vm3800_vm5 = vcmask 1041408   ;;  %vm3719_vm6 = vcmask 588800  }
  0x1f   :  { %1761 = vmatpush1.bf16.msra.mxu0 %v4515_v30  ;;  %v4579_v30 = vld [vmem:[%s6561_s1 + $0x5f4] ss:$20 sps:$4 sm:$0xff]   ;;  %v5472_v61 = vrot.slane %v4668_v58, %v5286_v52  ;;  %v4638_v19 = vld [vmem:[%s6561_s1 + $0x238] ss:$20 sps:$4 sm:$0xff]   ;;  %v4649_v20 = vld [vmem:[%s6561_s1 + $0x6bc] ss:$20 sps:$4 sm:$0xff]  }
  0x20   :  { %1802 = vmatpush1.bf16.msra.mxu1 %v4516_v31  ;;  %1762 = vmatprep.subr.bf16.mxu0 %v4517_v32  ;;  %v4582_v31 = vld [vmem:[%s6561_s1 + $0x124] ss:$20 sps:$4 sm:$0xff]   ;;  %v4646_v21 = vld [vmem:[%s6561_s1 + $0x214] ss:$20 sps:$4 sm:$0xff]   ;;  %vm3796_vm7 = vcmask 293888   ;;  %vm3844_vm8 = vcmask 80896  }
  0x21   :  { %1803 = vmatprep.subr.bf16.mxu1 %v4519_v33  ;;  %v4577_v32 = vld [vmem:[%s6561_s1 + $0x5f0] ss:$20 sps:$4 sm:$0xff]   ;;  %v132_v33 = vcombine.low %v115_v28, %v129_v29  ;;  %v4650_v29 = vld [vmem:[%s6561_s1 + $0x1e8] ss:$20 sps:$4 sm:$0xff]   ;;  %v4688_v58 = vld [vmem:[%s6561_s1 + $0x5f8] ss:$20 sps:$4 sm:$0xff]  }
  0x22   :  { %v4653_v28 = vld [vmem:[%s6561_s1 + $0x690] ss:$20 sps:$4 sm:$0xff]  }
  0x23   :  { %1763 = vmatpush2.bf16.msra.mxu0 %v4521_v34  ;;  %v4585_v34 = vld [vmem:[%s6561_s1 + $0x5cc] ss:$20 sps:$4 sm:$0xff]   ;;  %v5406_v38 = vpack.c.bf16 %v132_v33, %v132_v33 }
  0x24   :  { %1804 = vmatpush2.bf16.msra.mxu1 %v4522_v35  ;;  %1764 = vmatprep.subr.bf16.mxu0 %v4523_v36  ;;  %v5066_v35 = vmov 0   ;;  %v4580_v36 = vld [vmem:[%s6561_s1 + $0x120] ss:$20 sps:$4 sm:$0xff]  }
  0x25   :  { %1805 = vmatprep.subr.bf16.mxu1 %v4525_v37  ;;  %v4583_v37 = vld [vmem:[%s6561_s1 + $0x5c8] ss:$20 sps:$4 sm:$0xff]   ;;  %v4656_v33 = vld [vmem:[%s6561_s1 + $0x1c0] ss:$20 sps:$4 sm:$0xff]  }
  0x27   :  { %1765 = vmatpush2.bf16.msra.mxu0 %v4527_v41  ;;  %v4590_v41 = vld [vmem:[%s6561_s1 + $0xf8] ss:$20 sps:$4 sm:$0xff]  }
  0x28   :  { %1806 = vmatpush2.bf16.msra.mxu1 %v4528_v42  ;;  %1766 = vmatprep.subr.bf16.mxu0 %v4529_v43  ;;  %v4593_v42 = vld [vmem:[%s6561_s1 + $0x5a0] ss:$20 sps:$4 sm:$0xff]   ;;  %v4601_v43 = vld [vmem:[%s6561_s1 + $0x57c] ss:$20 sps:$4 sm:$0xff]  }
  0x29   :  { %1807 = vmatprep.subr.bf16.mxu1 %v4531_v44  ;;  %v4598_v44 = vld [vmem:[%s6561_s1 + $0xd4] ss:$20 sps:$4 sm:$0xff]  }
  0x2b   :  { %1767 = vmatpush2.bf16.msra.mxu0 %v4533_v47  ;;  %v4599_v47 = vld [vmem:[%s6561_s1 + $0x578] ss:$20 sps:$4 sm:$0xff]  }
  0x2c   :  { %1808 = vmatpush2.bf16.msra.mxu1 %v4534_v48  ;;  %1768 = vmatprep.subr.bf16.mxu0 %v4535_v49  ;;  %v4607_v48 = vld [vmem:[%s6561_s1 + $0x554] ss:$20 sps:$4 sm:$0xff]   ;;  %v4604_v49 = vld [vmem:[%s6561_s1 + $0xac] ss:$20 sps:$4 sm:$0xff]  }
  0x2d   :  { %1809 = vmatprep.subr.bf16.mxu1 %v4537_v50  ;;  %v4602_v50 = vld [vmem:[%s6561_s1 + $0xa8] ss:$20 sps:$4 sm:$0xff]  }
  0x2f   :  { %1769 = vmatpush2.bf16.msra.mxu0 %v4539_v51  ;;  %v4605_v51 = vld [vmem:[%s6561_s1 + $0x550] ss:$20 sps:$4 sm:$0xff]  }
  0x30   :  { %1810 = vmatpush2.bf16.msra.mxu1 %v4540_v53  ;;  %1770 = vmatprep.subr.bf16.mxu0 %v4541_v54  ;;  %v4613_v53 = vld [vmem:[%s6561_s1 + $0x52c] ss:$20 sps:$4 sm:$0xff]   ;;  %v4610_v54 = vld [vmem:[%s6561_s1 + $0x84] ss:$20 sps:$4 sm:$0xff]  }
  0x31   :  { %1811 = vmatprep.subr.bf16.mxu1 %v4543_v59  ;;  %v4669_v59 = vld [vmem:[%s6560_s0 + $0x24] ss:$14 sps:$4 sm:$0xff]  }
  0x32   :  { %v5475_v62 = vrot.slane %v4669_v59, %v5286_v52  ;;  %v4622_v52 = vld [vmem:[%s6561_s1 + $0x34] ss:$20 sps:$4 sm:$0xff]  }
  0x33   :  { %1771 = vmatpush2.bf16.msra.mxu0 %v4545_v0  ;;  %v4614_v0 = vld [vmem:[%s6561_s1 + $0x58] ss:$20 sps:$4 sm:$0xff]   ;;  %v4691_v59 = vld [vmem:[%s6561_s1 + $0x328] ss:$20 sps:$4 sm:$0xff]  }
  0x34   :  { %1812 = vmatpush2.bf16.msra.mxu1 %v4546_v2  ;;  %1772 = vmatprep.subr.bf16.mxu0 %v4547_v3  ;;  %v131_v2 = vcombine.high %v5472_v61, %v5475_v62 }
  0x35   :  { %1813 = vmatprep.subr.bf16.mxu1 %v4549_v5  ;;  %v4620_v5 = vld [vmem:[%s6561_s1 + $0x30] ss:$20 sps:$4 sm:$0xff]  }
  0x36   :  { %v5491_v3 = vpack.c.bf16 %v131_v2, %v131_v2  ;;  %v4700_v2 = vld [vmem:[%s6561_s1 + $0x5a8] ss:$20 sps:$4 sm:$0xff]  }
  0x37   :  { %1773 = vmatpush2.bf16.msra.mxu0 %v4551_v6  ;;  %v4631_v6 = vld [vmem:[%s6561_s1 + $0x734] ss:$20 sps:$4 sm:$0xff]  }
  0x38   :  { %1814 = vmatpush2.bf16.msra.mxu1 %v4552_v8  ;;  %1774 = vmatprep.subr.bf16.mxu0 %v4553_v10  ;;  %v4628_v8 = vld [vmem:[%s6561_s1 + $0xc] ss:$20 sps:$4 sm:$0xff]   ;;  %v4629_v10 = vld [vmem:[%s6561_s1 + $0x730] ss:$20 sps:$4 sm:$0xff]  }
  0x39   :  { %1815 = vmatprep.subr.bf16.mxu1 %v4555_v11  ;;  %v4626_v11 = vld [vmem:[%s6561_s1 + $0x8] ss:$20 sps:$4 sm:$0xff]  }
  0x3b   :  { %1775 = vmatpush2.bf16.msra.mxu0 %v4557_v12  ;;  %v4637_v12 = vld [vmem:[%s6561_s1 + $0x70c] ss:$20 sps:$4 sm:$0xff]  }
  0x3c   :  { %1816 = vmatpush2.bf16.msra.mxu1 %v4558_v13  ;;  %1776 = vmatprep.subr.bf16.mxu0 %v4559_v14  ;;  %v4634_v13 = vld [vmem:[%s6561_s1 + $0x264] ss:$20 sps:$4 sm:$0xff]   ;;  %v4635_v14 = vld [vmem:[%s6561_s1 + $0x708] ss:$20 sps:$4 sm:$0xff]  }
  0x3d   :  { %1817 = vmatprep.subr.bf16.mxu1 %v4561_v15  ;;  %v4632_v15 = vld [vmem:[%s6561_s1 + $0x260] ss:$20 sps:$4 sm:$0xff]  }
  0x3f   :  { %1777 = vmatpush2.bf16.msra.mxu0 %v4563_v16  ;;  %v4643_v16 = vld [vmem:[%s6561_s1 + $0x6e4] ss:$20 sps:$4 sm:$0xff]  }
  0x40   :  { %1818 = vmatpush2.bf16.msra.mxu1 %v4564_v17  ;;  %1828 = vmatprep.subr.bf16.mxu0 %v4573_v22  ;;  %v4640_v17 = vld [vmem:[%s6561_s1 + $0x23c] ss:$20 sps:$4 sm:$0xff]   ;;  %v4647_v22 = vld [vmem:[%s6561_s1 + $0x6b8] ss:$20 sps:$4 sm:$0xff]  }
  0x41   :  { %1883 = vmatprep.subr.bf16.mxu1 %v4576_v23  ;;  %v4644_v23 = vld [vmem:[%s6561_s1 + $0x210] ss:$20 sps:$4 sm:$0xff]  }
  0x42   :  { %1779 = vmatmul.mubr.bf16.vlgmr.msra.gmra.mxu0 %v5373_v24 }
  0x43   :  { %1820 = vmatmul.mubr.bf16.vlgmr.msra.gmra.mxu1 %v5378_v26  ;;  %1829 = vmatpush1.bf16.msra.mxu0 %v4571_v25  ;;  %v4655_v25 = vld [vmem:[%s6561_s1 + $0x694] ss:$20 sps:$4 sm:$0xff]  }
  0x44   :  { %1830 = vmatprep.subr.bf16.mxu0 %v4579_v30  ;;  %1884 = vmatpush1.bf16.msra.mxu1 %v4574_v27  ;;  %v4652_v27 = vld [vmem:[%s6561_s1 + $0x1ec] ss:$20 sps:$4 sm:$0xff]  }
  0x45   :  { %1901 = vmatprep.mubr.bf16.mxu1 %v5066_v35  ;;  %1910 = vmatprep.subr.bf16.mxu1 %v4582_v31  ;;  %v4661_v30 = vld [vmem:[%s6561_s1 + $0x66c] ss:$20 sps:$4 sm:$0xff]   ;;  %v4658_v31 = vld [vmem:[%s6561_s1 + $0x1c4] ss:$20 sps:$4 sm:$0xff]  }
  0x46   :  { %1860 = vmatprep.mubr.bf16.mxu0 %v5491_v3 }
  0x47   :  { %1831 = vmatpush1.bf16.msra.mxu0 %v4577_v32  ;;  %v4659_v32 = vld [vmem:[%s6561_s1 + $0x668] ss:$20 sps:$4 sm:$0xff]  }
  0x48   :  { %1832 = vmatprep.subr.bf16.mxu0 %v4585_v34  ;;  %v4667_v34 = vld [vmem:[%s6561_s1 + $0x644] ss:$20 sps:$4 sm:$0xff]  }
  0x4b   :  { %4120 = vmatmul.mubr.msk.bf16.vlgmr.msra.gmra.mxu1 %vm1742_vm0, %v5406_v38  ;;  %1833 = vmatpush1.bf16.msra.mxu0 %v4583_v37  ;;  %v130_v37 = vcombine.low %v5472_v61, %v5475_v62  ;;  %v4696_v61 = vld [vmem:[%s6561_s1 + $0x5d4] ss:$20 sps:$4 sm:$0xff]   ;;  %v4694_v62 = vld [vmem:[%s6561_s1 + $0x5d0] ss:$20 sps:$4 sm:$0xff]  }
  0x4c   :  { %1911 = vmatpush1.bf16.msra.mxu1 %v4580_v36  ;;  %1834 = vmatprep.subr.bf16.mxu0 %v4595_v39  ;;  %v4664_v36 = vld [vmem:[%s6561_s1 + $0x19c] ss:$20 sps:$4 sm:$0xff]   ;;  %v4665_v39 = vld [vmem:[%s6561_s1 + $0x640] ss:$20 sps:$4 sm:$0xff]  }
  0x4d   :  { %1912 = vmatprep.subr.bf16.mxu1 %v4592_v40  ;;  %1942 = vmatprep.mubr.bf16.mxu1 %v5328_v7  ;;  %v4662_v40 = vld [vmem:[%s6561_s1 + $0x198] ss:$20 sps:$4 sm:$0xff]  }
  0x4f   :  { %1835 = vmatpush1.bf16.msra.mxu0 %v4593_v42  ;;  %v4672_v42 = vld [vmem:[%s6561_s1 + $0x174] ss:$20 sps:$4 sm:$0xff]  }
  0x50   :  { %1913 = vmatpush1.bf16.msra.mxu1 %v4590_v41  ;;  %1836 = vmatprep.subr.bf16.mxu0 %v4601_v43  ;;  %v4675_v41 = vld [vmem:[%s6561_s1 + $0x3a4] ss:$20 sps:$4 sm:$0xff]   ;;  %v5592_v43 = vpack.c.bf16 %v130_v37, %v130_v37  ;;  %v4753_v37 = vld [vmem:[%s6561_s1 + $0x41c] ss:$20 sps:$4 sm:$0xff]  }
  0x51   :  { %1914 = vmatprep.subr.bf16.mxu1 %v4598_v44  ;;  %v4673_v44 = vld [vmem:[%s6561_s1 + $0x3a0] ss:$20 sps:$4 sm:$0xff]  }
  0x53   :  { %1837 = vmatpush1.bf16.msra.mxu0 %v4599_v47  ;;  %v4681_v47 = vld [vmem:[%s6561_s1 + $0x37c] ss:$20 sps:$4 sm:$0xff]  }
  0x54   :  { %1915 = vmatpush1.bf16.msra.mxu1 %v4596_v45  ;;  %1838 = vmatprep.subr.bf16.mxu0 %v4607_v48  ;;  %v4670_v45 = vld [vmem:[%s6561_s1 + $0x170] ss:$20 sps:$4 sm:$0xff]   ;;  %v4678_v48 = vld [vmem:[%s6561_s1 + $0x14c] ss:$20 sps:$4 sm:$0xff]  }
  0x55   :  { %1916 = vmatprep.subr.bf16.mxu1 %v4604_v49  ;;  %v4679_v49 = vld [vmem:[%s6561_s1 + $0x378] ss:$20 sps:$4 sm:$0xff]  }
  0x57   :  { %1839 = vmatpush1.bf16.msra.mxu0 %v4605_v51  ;;  %v4687_v51 = vld [vmem:[%s6561_s1 + $0x354] ss:$20 sps:$4 sm:$0xff]  }
  0x58   :  { %1917 = vmatpush1.bf16.msra.mxu1 %v4602_v50  ;;  %1840 = vmatprep.subr.bf16.mxu0 %v4613_v53  ;;  %v4676_v50 = vld [vmem:[%s6561_s1 + $0x148] ss:$20 sps:$4 sm:$0xff]   ;;  %v4684_v53 = vld [vmem:[%s6561_s1 + $0x624] ss:$20 sps:$4 sm:$0xff]  }
  0x59   :  { %1918 = vmatprep.subr.bf16.mxu1 %v4610_v54  ;;  %v4682_v54 = vld [vmem:[%s6561_s1 + $0x620] ss:$20 sps:$4 sm:$0xff]  }
  0x5b   :  { %1841 = vmatpush1.bf16.msra.mxu0 %v4611_v56  ;;  %v4693_v56 = vld [vmem:[%s6561_s1 + $0x32c] ss:$20 sps:$4 sm:$0xff]  }
  0x5c   :  { %1919 = vmatpush1.bf16.msra.mxu1 %v4608_v55  ;;  %1842 = vmatprep.subr.bf16.mxu0 %v4619_v57  ;;  %v4685_v55 = vld [vmem:[%s6561_s1 + $0x350] ss:$20 sps:$4 sm:$0xff]  }
  0x5d   :  { %1920 = vmatprep.subr.bf16.mxu1 %v4616_v60  ;;  %v4690_v57 = vld [vmem:[%s6561_s1 + $0x5fc] ss:$20 sps:$4 sm:$0xff]   ;;  %v4699_v60 = vld [vmem:[%s6561_s1 + $0x304] ss:$20 sps:$4 sm:$0xff]  }
  0x5f   :  { %1843 = vmatpush1.bf16.msra.mxu0 %v4617_v63  ;;  %v4697_v63 = vld [vmem:[%s6561_s1 + $0x300] ss:$20 sps:$4 sm:$0xff]  }
  0x60   :  { %1921 = vmatpush1.bf16.msra.mxu1 %v4614_v0  ;;  %1844 = vmatprep.subr.bf16.mxu0 %v4625_v1  ;;  %v4705_v0 = vld [vmem:[%s6561_s1 + $0x2dc] ss:$20 sps:$4 sm:$0xff]   ;;  %v4702_v1 = vld [vmem:[%s6561_s1 + $0x5ac] ss:$20 sps:$4 sm:$0xff]  }
  0x61   :  { %1922 = vmatprep.subr.bf16.mxu1 %v4622_v52  ;;  %v4703_v52 = vld [vmem:[%s6561_s1 + $0x2d8] ss:$20 sps:$4 sm:$0xff]  }
  0x63   :  { %1845 = vmatpush2.bf16.msra.mxu0 %v4623_v4  ;;  %v4711_v4 = vld [vmem:[%s6561_s1 + $0x2b4] ss:$20 sps:$4 sm:$0xff]  }
  0x64   :  { %1923 = vmatpush1.bf16.msra.mxu1 %v4620_v5  ;;  %1846 = vmatprep.subr.bf16.mxu0 %v4631_v6  ;;  %v4708_v5 = vld [vmem:[%s6561_s1 + $0x584] ss:$20 sps:$4 sm:$0xff]   ;;  %v4706_v6 = vld [vmem:[%s6561_s1 + $0x580] ss:$20 sps:$4 sm:$0xff]  }
  0x65   :  { %1924 = vmatprep.subr.bf16.mxu1 %v4628_v8  ;;  %v4709_v8 = vld [vmem:[%s6561_s1 + $0x2b0] ss:$20 sps:$4 sm:$0xff]  }
  0x67   :  { %1847 = vmatpush2.bf16.msra.mxu0 %v4629_v10  ;;  %v4717_v10 = vld [vmem:[%s6561_s1 + $0x28c] ss:$20 sps:$4 sm:$0xff]  }
  0x68   :  { %1925 = vmatpush1.bf16.msra.mxu1 %v4626_v11  ;;  %1848 = vmatprep.subr.bf16.mxu0 %v4637_v12  ;;  %v4714_v11 = vld [vmem:[%s6561_s1 + $0x55c] ss:$20 sps:$4 sm:$0xff]   ;;  %v4712_v12 = vld [vmem:[%s6561_s1 + $0x558] ss:$20 sps:$4 sm:$0xff]  }
  0x69   :  { %1926 = vmatprep.subr.bf16.mxu1 %v4634_v13  ;;  %v4715_v13 = vld [vmem:[%s6561_s1 + $0x288] ss:$20 sps:$4 sm:$0xff]  }
  0x6b   :  { %1849 = vmatpush2.bf16.msra.mxu0 %v4635_v14  ;;  %v4723_v14 = vld [vmem:[%s6561_s1 + $0x4e4] ss:$20 sps:$4 sm:$0xff]  }
  0x6c   :  { %1927 = vmatpush2.bf16.msra.mxu1 %v4632_v15  ;;  %1850 = vmatprep.subr.bf16.mxu0 %v4643_v16  ;;  %v4720_v15 = vld [vmem:[%s6561_s1 + $0x534] ss:$20 sps:$4 sm:$0xff]   ;;  %v4718_v16 = vld [vmem:[%s6561_s1 + $0x530] ss:$20 sps:$4 sm:$0xff]  }
  0x6d   :  { %1928 = vmatprep.subr.bf16.mxu1 %v4640_v17  ;;  %v4721_v17 = vld [vmem:[%s6561_s1 + $0x4e0] ss:$20 sps:$4 sm:$0xff]  }
  0x6f   :  { %1851 = vmatpush2.bf16.msra.mxu0 %v4641_v18  ;;  %v4729_v18 = vld [vmem:[%s6561_s1 + $0x4bc] ss:$20 sps:$4 sm:$0xff]  }
  0x70   :  { %1929 = vmatpush2.bf16.msra.mxu1 %v4638_v19  ;;  %1852 = vmatprep.subr.bf16.mxu0 %v4649_v20  ;;  %v4726_v19 = vld [vmem:[%s6561_s1 + $0x50c] ss:$20 sps:$4 sm:$0xff]   ;;  %v4724_v20 = vld [vmem:[%s6561_s1 + $0x508] ss:$20 sps:$4 sm:$0xff]  }
  0x71   :  { %1930 = vmatprep.subr.bf16.mxu1 %v4646_v21  ;;  %v4727_v21 = vld [vmem:[%s6561_s1 + $0x4b8] ss:$20 sps:$4 sm:$0xff]  }
  0x73   :  { %1853 = vmatpush2.bf16.msra.mxu0 %v4647_v22  ;;  %v4735_v22 = vld [vmem:[%s6561_s1 + $0x494] ss:$20 sps:$4 sm:$0xff]  }
  0x74   :  { %1931 = vmatpush2.bf16.msra.mxu1 %v4644_v23  ;;  %1854 = vmatprep.subr.bf16.mxu0 %v4655_v25  ;;  %v4732_v23 = vld [vmem:[%s6561_s1 + $0x764] ss:$20 sps:$4 sm:$0xff]   ;;  %v4730_v25 = vld [vmem:[%s6561_s1 + $0x760] ss:$20 sps:$4 sm:$0xff]  }
  0x75   :  { %1932 = vmatprep.subr.bf16.mxu1 %v4652_v27  ;;  %v4733_v27 = vld [vmem:[%s6561_s1 + $0x490] ss:$20 sps:$4 sm:$0xff]  }
  0x77   :  { %1855 = vmatpush2.bf16.msra.mxu0 %v4653_v28  ;;  %v4741_v28 = vld [vmem:[%s6561_s1 + $0x46c] ss:$20 sps:$4 sm:$0xff]  }
  0x78   :  { %1933 = vmatpush2.bf16.msra.mxu1 %v4650_v29  ;;  %1856 = vmatprep.subr.bf16.mxu0 %v4661_v30  ;;  %v4738_v29 = vld [vmem:[%s6561_s1 + $0x73c] ss:$20 sps:$4 sm:$0xff]   ;;  %v4736_v30 = vld [vmem:[%s6561_s1 + $0x738] ss:$20 sps:$4 sm:$0xff]  }
  0x79   :  { %1934 = vmatprep.subr.bf16.mxu1 %v4658_v31  ;;  %v4739_v31 = vld [vmem:[%s6561_s1 + $0x468] ss:$20 sps:$4 sm:$0xff]  }
  0x7b   :  { %1857 = vmatpush2.bf16.msra.mxu0 %v4659_v32  ;;  %v4747_v32 = vld [vmem:[%s6561_s1 + $0x444] ss:$20 sps:$4 sm:$0xff]  }
  0x7c   :  { %1935 = vmatpush2.bf16.msra.mxu1 %v4656_v33  ;;  %1858 = vmatprep.subr.bf16.mxu0 %v4667_v34  ;;  %v4744_v33 = vld [vmem:[%s6561_s1 + $0x714] ss:$20 sps:$4 sm:$0xff]   ;;  %v4742_v34 = vld [vmem:[%s6561_s1 + $0x710] ss:$20 sps:$4 sm:$0xff]  }
  0x7d   :  { %1936 = vmatprep.subr.bf16.mxu1 %v4664_v36  ;;  %v4745_v36 = vld [vmem:[%s6561_s1 + $0x440] ss:$20 sps:$4 sm:$0xff]  }
  0x7f   :  { %1859 = vmatpush2.bf16.msra.mxu0 %v4665_v39  ;;  %v4750_v39 = vld [vmem:[%s6561_s1 + $0x6ec] ss:$20 sps:$4 sm:$0xff]  }
  0x80   :  { %1937 = vmatpush2.bf16.msra.mxu1 %v4662_v40  ;;  %1951 = vmatprep.subr.bf16.mxu0 %v4675_v41  ;;  %v4751_v40 = vld [vmem:[%s6561_s1 + $0x418] ss:$20 sps:$4 sm:$0xff]   ;;  %v4748_v41 = vld [vmem:[%s6561_s1 + $0x6e8] ss:$20 sps:$4 sm:$0xff]  }
  0x81   :  { %1938 = vmatprep.subr.bf16.mxu1 %v4672_v42  ;;  %v4759_v42 = vld [vmem:[%s6561_s1 + $0x3f4] ss:$20 sps:$4 sm:$0xff]  }
  0x82   :  { %1861 = vmatmul.mubr.bf16.vlgmr.msra.gmra.mxu0 %v5592_v43 }
  0x83   :  { %1952 = vmatpush1.bf16.msra.mxu0 %v4673_v44  ;;  %1983 = vmatprep.mubr.bf16.mxu0 %v5333_v9  ;;  %v4756_v44 = vld [vmem:[%s6561_s1 + $0x6c4] ss:$20 sps:$4 sm:$0xff]  }
  0x84   :  { %1939 = vmatpush2.bf16.msra.mxu1 %v4670_v45  ;;  %1953 = vmatprep.subr.bf16.mxu0 %v4681_v47  ;;  %v4754_v45 = vld [vmem:[%s6561_s1 + $0x6c0] ss:$20 sps:$4 sm:$0xff]   ;;  %v4757_v47 = vld [vmem:[%s6561_s1 + $0x3f0] ss:$20 sps:$4 sm:$0xff]  }
  0x85   :  { %1940 = vmatprep.subr.bf16.mxu1 %v4678_v48  ;;  %v4765_v48 = vld [vmem:[%s6561_s1 + $0x3cc] ss:$20 sps:$4 sm:$0xff]  }
  0x87   :  { %1954 = vmatpush1.bf16.msra.mxu0 %v4679_v49  ;;  %v4762_v49 = vld [vmem:[%s6561_s1 + $0x69c] ss:$20 sps:$4 sm:$0xff]  }
  0x88   :  { %1941 = vmatpush2.bf16.msra.mxu1 %v4676_v50  ;;  %1955 = vmatprep.subr.bf16.mxu0 %v4687_v51  ;;  %v4763_v50 = vld [vmem:[%s6561_s1 + $0x3c8] ss:$20 sps:$4 sm:$0xff]   ;;  %v4760_v51 = vld [vmem:[%s6561_s1 + $0x698] ss:$20 sps:$4 sm:$0xff]  }
  0x89   :  { %1992 = vmatprep.subr.bf16.mxu1 %v4684_v53  ;;  %v4771_v53 = vld [vmem:[%s6561_s1 + $0x78c] ss:$20 sps:$4 sm:$0xff]  }
  0x8b   :  { %1943 = vmatmul.mubr.bf16.vlgmr.msra.gmra.mxu1 %v5373_v24  ;;  %1956 = vmatpush1.bf16.msra.mxu0 %v4685_v55  ;;  %v4769_v55 = vld [vmem:[%s6561_s1 + $0x788] ss:$20 sps:$4 sm:$0xff]  }
  0x8c   :  { %1993 = vmatpush1.bf16.msra.mxu1 %v4682_v54  ;;  %1957 = vmatprep.subr.bf16.mxu0 %v4693_v56  ;;  %v4768_v54 = vld [vmem:[%s6561_s1 + $0x674] ss:$20 sps:$4 sm:$0xff]   ;;  %v4766_v56 = vld [vmem:[%s6561_s1 + $0x670] ss:$20 sps:$4 sm:$0xff]  }
  0x8d   :  { %1994 = vmatprep.subr.bf16.mxu1 %v4690_v57  ;;  %2024 = vmatprep.mubr.bf16.mxu1 %v5491_v3  ;;  %v4775_v57 = vld [vmem:[%s6561_s1 + $0x268] ss:$20 sps:$4 sm:$0xff]  }
  0x8f   :  { %1958 = vmatpush1.bf16.msra.mxu0 %v4691_v59  ;;  %v4772_v59 = vld [vmem:[%s6561_s1 + $0x648] ss:$20 sps:$4 sm:$0xff]  }
  0x90   :  { %1995 = vmatpush1.bf16.msra.mxu1 %v4688_v58  ;;  %1959 = vmatprep.subr.bf16.mxu0 %v4699_v60  ;;  %v4774_v58 = vld [vmem:[%s6561_s1 + $0x64c] ss:$20 sps:$4 sm:$0xff]   ;;  %v4777_v60 = vld [vmem:[%s6561_s1 + $0x4e8] ss:$20 sps:$4 sm:$0xff]  }
  0x91   :  { %1996 = vmatprep.subr.bf16.mxu1 %v4696_v61  ;;  %v4776_v61 = vld [vmem:[%s6561_s1 + $0x128] ss:$20 sps:$4 sm:$0xff]  }
  0x93   :  { %1960 = vmatpush1.bf16.msra.mxu0 %v4697_v63  ;;  %v4779_v63 = vld [vmem:[%s6561_s1 + $0x240] ss:$20 sps:$4 sm:$0xff]  }
  0x94   :  { %1997 = vmatpush1.bf16.msra.mxu1 %v4694_v62  ;;  %1961 = vmatprep.subr.bf16.mxu0 %v4705_v0  ;;  %v4778_v62 = vld [vmem:[%s6561_s1 + $0x3a8] ss:$20 sps:$4 sm:$0xff]   ;;  %v4781_v0 = vld [vmem:[%s6561_s1 + $0x4c0] ss:$20 sps:$4 sm:$0xff]  }
  0x95   :  { %1998 = vmatprep.subr.bf16.mxu1 %v4702_v1  ;;  %v4780_v1 = vld [vmem:[%s6561_s1 + $0x100] ss:$20 sps:$4 sm:$0xff]  }
  0x97   :  { %1962 = vmatpush1.bf16.msra.mxu0 %v4703_v52  ;;  %v4783_v52 = vld [vmem:[%s6561_s1 + $0x218] ss:$20 sps:$4 sm:$0xff]  }
  0x98   :  { %1999 = vmatpush1.bf16.msra.mxu1 %v4700_v2  ;;  %1963 = vmatprep.subr.bf16.mxu0 %v4711_v4  ;;  %v4782_v2 = vld [vmem:[%s6561_s1 + $0x380] ss:$20 sps:$4 sm:$0xff]   ;;  %v4785_v4 = vld [vmem:[%s6561_s1 + $0x498] ss:$20 sps:$4 sm:$0xff]  }
  0x99   :  { %2000 = vmatprep.subr.bf16.mxu1 %v4708_v5  ;;  %v4784_v5 = vld [vmem:[%s6561_s1 + $0xd8] ss:$20 sps:$4 sm:$0xff]  }
  0x9b   :  { %1964 = vmatpush1.bf16.msra.mxu0 %v4709_v8  ;;  %v4787_v8 = vld [vmem:[%s6561_s1 + $0x1f0] ss:$20 sps:$4 sm:$0xff]  }
  0x9c   :  { %2001 = vmatpush1.bf16.msra.mxu1 %v4706_v6  ;;  %1965 = vmatprep.subr.bf16.mxu0 %v4717_v10  ;;  %v4786_v6 = vld [vmem:[%s6561_s1 + $0x358] ss:$20 sps:$4 sm:$0xff]   ;;  %v4790_v10 = vld [vmem:[%s6561_s1 + $0x330] ss:$20 sps:$4 sm:$0xff]  }
  0x9d   :  { %2002 = vmatprep.subr.bf16.mxu1 %v4714_v11  ;;  %v4791_v11 = vld [vmem:[%s6561_s1 + $0x1c8] ss:$20 sps:$4 sm:$0xff]  }
  0x9f   :  { %1966 = vmatpush1.bf16.msra.mxu0 %v4715_v13  ;;  %v4792_v13 = vld [vmem:[%s6561_s1 + $0x88] ss:$20 sps:$4 sm:$0xff]  }
  0xa0   :  { %2003 = vmatpush1.bf16.msra.mxu1 %v4712_v12  ;;  %1967 = vmatprep.subr.bf16.mxu0 %v4723_v14  ;;  %v4793_v12 = vld [vmem:[%s6561_s1 + $0x448] ss:$20 sps:$4 sm:$0xff]  }
  0xa1   :  { %2004 = vmatprep.subr.bf16.mxu1 %v4720_v15  ;;  %v4794_v14 = vld [vmem:[%s6561_s1 + $0x308] ss:$20 sps:$4 sm:$0xff]   ;;  %v4795_v15 = vld [vmem:[%s6561_s1 + $0x1a0] ss:$20 sps:$4 sm:$0xff]  }
  0xa3   :  { %1968 = vmatpush2.bf16.msra.mxu0 %v4721_v17  ;;  %v4796_v17 = vld [vmem:[%s6561_s1 + $0x60] ss:$20 sps:$4 sm:$0xff]  }
  0xa4   :  { %2005 = vmatpush1.bf16.msra.mxu1 %v4718_v16  ;;  %1969 = vmatprep.subr.bf16.mxu0 %v4729_v18  ;;  %v4797_v16 = vld [vmem:[%s6561_s1 + $0x420] ss:$20 sps:$4 sm:$0xff]  }
  0xa5   :  { %2006 = vmatprep.subr.bf16.mxu1 %v4726_v19  ;;  %v4798_v18 = vld [vmem:[%s6561_s1 + $0x2e0] ss:$20 sps:$4 sm:$0xff]   ;;  %v4799_v19 = vld [vmem:[%s6561_s1 + $0x178] ss:$20 sps:$4 sm:$0xff]  }
  0xa7   :  { %1970 = vmatpush2.bf16.msra.mxu0 %v4727_v21  ;;  %v4801_v21 = vld [vmem:[%s6561_s1 + $0x3f8] ss:$20 sps:$4 sm:$0xff]  }
  0xa8   :  { %2007 = vmatpush1.bf16.msra.mxu1 %v4724_v20  ;;  %1971 = vmatprep.subr.bf16.mxu0 %v4735_v22  ;;  %v4800_v20 = vld [vmem:[%s6561_s1 + $0x38] ss:$20 sps:$4 sm:$0xff]  }
  0xa9   :  { %2008 = vmatprep.subr.bf16.mxu1 %v4732_v23  ;;  %v4802_v22 = vld [vmem:[%s6561_s1 + $0x2b8] ss:$20 sps:$4 sm:$0xff]   ;;  %v4803_v23 = vld [vmem:[%s6561_s1 + $0x150] ss:$20 sps:$4 sm:$0xff]  }
  0xab   :  { %1972 = vmatpush2.bf16.msra.mxu0 %v4733_v27  ;;  %v4804_v27 = vld [vmem:[%s6561_s1 + $0x10] ss:$20 sps:$4 sm:$0xff]  }
  0xac   :  { %2009 = vmatpush2.bf16.msra.mxu1 %v4730_v25  ;;  %1973 = vmatprep.subr.bf16.mxu0 %v4741_v28  ;;  %v4805_v25 = vld [vmem:[%s6561_s1 + $0x3d0] ss:$20 sps:$4 sm:$0xff]  }
  0xad   :  { %2010 = vmatprep.subr.bf16.mxu1 %v4738_v29  ;;  %v4806_v28 = vld [vmem:[%s6561_s1 + $0x290] ss:$20 sps:$4 sm:$0xff]   ;;  %v4807_v29 = vld [vmem:[%s6561_s1 + $0x768] ss:$20 sps:$4 sm:$0xff]  }
  0xaf   :  { %1974 = vmatpush2.bf16.msra.mxu0 %v4739_v31  ;;  %v4809_v31 = vld [vmem:[%s6561_s1 + $0x740] ss:$20 sps:$4 sm:$0xff]  }
  0xb0   :  { %2011 = vmatpush2.bf16.msra.mxu1 %v4736_v30  ;;  %1975 = vmatprep.subr.bf16.mxu0 %v4747_v32  ;;  %v4808_v30 = vld [vmem:[%s6561_s1 + $0x628] ss:$20 sps:$4 sm:$0xff]   ;;  %v4823_v32 = vld [vmem:[%s6561_s1 + $0x790] ss:$20 sps:$4 sm:$0xff]  }
  0xb1   :  { %2012 = vmatprep.subr.bf16.mxu1 %v4744_v33  ;;  %v4826_v33 = vld [vmem:[%s6563_s3 + $0xac] ss:$12 sps:$4 sm:$0xff]  }
  0xb3   :  { %1976 = vmatpush2.bf16.msra.mxu0 %v4745_v36  ;;  %v5067_v36 = vmov 0.0  }
  0xb4   :  { %2013 = vmatpush2.bf16.msra.mxu1 %v4742_v34  ;;  %1977 = vmatprep.subr.bf16.mxu0 %v4753_v37  ;;  %v4810_v34 = vld [vmem:[%s6561_s1 + $0x600] ss:$20 sps:$4 sm:$0xff]   ;;  %v4811_v37 = vld [vmem:[%s6561_s1 + $0x718] ss:$20 sps:$4 sm:$0xff]  }
  0xb5   :  { %2014 = vmatprep.subr.bf16.mxu1 %v4750_v39  ;;  %v4812_v39 = vld [vmem:[%s6561_s1 + $0x5d8] ss:$20 sps:$4 sm:$0xff]  }
  0xb7   :  { %1978 = vmatpush2.bf16.msra.mxu0 %v4751_v40  ;;  %v4829_v40 = vld [vmem:[%s6563_s3 + $0x94] ss:$12 sps:$4 sm:$0xff]  }
  0xb8   :  { %2015 = vmatpush2.bf16.msra.mxu1 %v4748_v41  ;;  %1979 = vmatprep.subr.bf16.mxu0 %v4759_v42  ;;  %v4815_v41 = vld [vmem:[%s6561_s1 + $0x6c8] ss:$20 sps:$4 sm:$0xff]  }
  0xb9   :  { %2016 = vmatprep.subr.bf16.mxu1 %v4756_v44  ;;  %v4827_v42 = vld [vmem:[%s6563_s3 + $0x90] ss:$12 sps:$4 sm:$0xff]  }
  0xba   :  { %v4832_v44 = vld [vmem:[%s6563_s3 + $0x7c] ss:$12 sps:$4 sm:$0xff]  }
  0xbb   :  { %1980 = vmatpush2.bf16.msra.mxu0 %v4757_v47  ;;  %v4817_v47 = vld [vmem:[%s6561_s1 + $0x6a0] ss:$20 sps:$4 sm:$0xff]  }
  0xbc   :  { %2017 = vmatpush2.bf16.msra.mxu1 %v4754_v45  ;;  %1981 = vmatprep.subr.bf16.mxu0 %v4765_v48  ;;  %v4816_v45 = vld [vmem:[%s6561_s1 + $0x588] ss:$20 sps:$4 sm:$0xff]   ;;  %v4830_v48 = vld [vmem:[%s6563_s3 + $0x78] ss:$12 sps:$4 sm:$0xff]  }
  0xbd   :  { %2018 = vmatprep.subr.bf16.mxu1 %v4762_v49  ;;  %v4818_v49 = vld [vmem:[%s6561_s1 + $0x560] ss:$20 sps:$4 sm:$0xff]  }
  0xbf   :  { %1982 = vmatpush2.bf16.msra.mxu0 %v4763_v50  ;;  %v4819_v50 = vld [vmem:[%s6561_s1 + $0x678] ss:$20 sps:$4 sm:$0xff]  }
  0xc0   :  { %2019 = vmatpush2.bf16.msra.mxu1 %v4760_v51  ;;  %2047 = vmatprep.subr.bf16.mxu0 %v4771_v53  ;;  %v4833_v51 = vld [vmem:[%s6563_s3 + $0x60] ss:$12 sps:$4 sm:$0xff]  }
  0xc1   :  { %2020 = vmatprep.subr.bf16.mxu1 %v4768_v54  ;;  %v4838_v53 = vld [vmem:[%s6563_s3 + $0x4c] ss:$12 sps:$4 sm:$0xff]  }
  0xc2   :  { %1984 = vmatmul.mubr.bf16.vlgmr.msra.gmra.mxu0 %v5378_v26  ;;  %v4820_v54 = vld [vmem:[%s6561_s1 + $0x538] ss:$20 sps:$4 sm:$0xff]  }
  0xc3   :  { %2048 = vmatpush1.bf16.msra.mxu0 %v4769_v55  ;;  %2065 = vmatprep.mubr.bf16.mxu0 %v5066_v35  ;;  %v4821_v55 = vld [vmem:[%s6561_s1 + $0x650] ss:$20 sps:$4 sm:$0xff]  }
  0xc4   :  { %2021 = vmatpush2.bf16.msra.mxu1 %v4766_v56  ;;  %4293 = vmatprep.subr.bf16.mxu0 %v4775_v57  ;;  %v4836_v56 = vld [vmem:[%s6563_s3 + $0x48] ss:$12 sps:$4 sm:$0xff]  }
  0xc5   :  { %2022 = vmatprep.subr.bf16.mxu1 %v4774_v58  ;;  %v4841_v57 = vld [vmem:[%s6563_s3 + $0x34] ss:$12 sps:$4 sm:$0xff]   ;;  %v4822_v58 = vld [vmem:[%s6561_s1 + $0x510] ss:$20 sps:$4 sm:$0xff]  }
  0xc8   :  { %2023 = vmatpush2.bf16.msra.mxu1 %v4772_v59 }
  0xc9   :  { %4315 = vmatprep.subr.bf16.mxu1 %v4777_v60  ;;  %v4839_v60 = vld [vmem:[%s6563_s3 + $0x30] ss:$12 sps:$4 sm:$0xff]  }
  0xca   :  { %4121 = vmatmul.mubr.msk.bf16.vlgmr.msra.gmra.mxu0 %vm1742_vm0, %v5406_v38 }
  0xcb   :  { %2025 = vmatmul.mubr.bf16.vlgmr.msra.gmra.mxu1 %v5592_v43  ;;  %4294 = vmatpush3.bf16.msra.mxu0 %v4776_v61 }
  0xcc   :  { %4316 = vmatpush3.bf16.msra.mxu1 %v4778_v62  ;;  %4295 = vmatprep.subr.bf16.mxu0 %v4779_v63  ;;  %v4844_v62 = vld [vmem:[%s6563_s3 + $0x1c] ss:$12 sps:$4 sm:$0xff]  }
  0xcd   :  { %4317 = vmatprep.subr.bf16.mxu1 %v4781_v0  ;;  %2106 = vmatprep.mubr.bf16.mxu0 %v5328_v7  ;;  %v4789_v7 = vld [vmem:[%s6561_s1 + $0x470] ss:$20 sps:$4 sm:$0xff]   ;;  %v4874_v0 = vld [vmem:[%s6563_s3 + $0x22c] ss:$12 sps:$4 sm:$0xff]  }
  0xce   :  { %2146 = vmatprep.mubr.bf16.mxu1 %v5333_v9  ;;  %v4788_v9 = vld [vmem:[%s6561_s1 + $0xb0] ss:$20 sps:$4 sm:$0xff]  }
  0xcf   :  { %4296 = vmatpush3.bf16.msra.mxu0 %v4780_v1 }
  0xd0   :  { %4318 = vmatpush3.bf16.msra.mxu1 %v4782_v2  ;;  %4297 = vmatprep.subr.bf16.mxu0 %v4783_v52  ;;  %v4872_v2 = vld [vmem:[%s6563_s3 + $0x228] ss:$12 sps:$4 sm:$0xff]  }
  0xd1   :  { %4319 = vmatprep.subr.bf16.mxu1 %v4785_v4  ;;  %v4842_v4 = vld [vmem:[%s6563_s3 + $0x18] ss:$12 sps:$4 sm:$0xff]  }
  0xd3   :  { %4298 = vmatpush3.bf16.msra.mxu0 %v4784_v5 }
  0xd4   :  { %4320 = vmatpush3.bf16.msra.mxu1 %v4786_v6  ;;  %4299 = vmatprep.subr.bf16.mxu0 %v4787_v8  ;;  %v4847_v8 = vld [vmem:[%s6563_s3 + $0x4] ss:$12 sps:$4 sm:$0xff]  }
  0xd5   :  { %4321 = vmatprep.subr.bf16.mxu1 %v4789_v7  ;;  %v4877_v7 = vld [vmem:[%s6563_s3 + $0x214] ss:$12 sps:$4 sm:$0xff]  }
  0xd7   :  { %4300 = vmatpush3.bf16.msra.mxu0 %v4788_v9 }
  0xd8   :  { %4322 = vmatpush3.bf16.msra.mxu1 %v4790_v10  ;;  %4301 = vmatprep.subr.bf16.mxu0 %v4791_v11  ;;  %v4875_v10 = vld [vmem:[%s6563_s3 + $0x210] ss:$12 sps:$4 sm:$0xff]   ;;  %v4845_v11 = vld [vmem:[%s6563_s3] ss:$12 sps:$4 sm:$0xff]  }
  0xd9   :  { %4323 = vmatprep.subr.bf16.mxu1 %v4793_v12 }
  0xdb   :  { %4302 = vmatpush3.bf16.msra.mxu0 %v4792_v13  ;;  %v4850_v13 = vld [vmem:[%s6563_s3 + $0x16c] ss:$12 sps:$4 sm:$0xff]  }
  0xdc   :  { %4324 = vmatpush3.bf16.msra.mxu1 %v4794_v14  ;;  %4303 = vmatprep.subr.bf16.mxu0 %v4795_v15  ;;  %v4880_v14 = vld [vmem:[%s6563_s3 + $0x1fc] ss:$12 sps:$4 sm:$0xff]  }
  0xdd   :  { %4325 = vmatprep.subr.bf16.mxu1 %v4797_v16  ;;  %v4848_v16 = vld [vmem:[%s6563_s3 + $0x168] ss:$12 sps:$4 sm:$0xff]  }
  0xdf   :  { %4304 = vmatpush3.bf16.msra.mxu0 %v4796_v17 }
  0xe0   :  { %4326 = vmatpush3.bf16.msra.mxu1 %v4798_v18  ;;  %4305 = vmatprep.subr.bf16.mxu0 %v4799_v19  ;;  %v4853_v18 = vld [vmem:[%s6563_s3 + $0x154] ss:$12 sps:$4 sm:$0xff]   ;;  %v4883_v19 = vld [vmem:[%s6563_s3 + $0x1e4] ss:$12 sps:$4 sm:$0xff]  }
  0xe1   :  { %4327 = vmatprep.subr.bf16.mxu1 %v4801_v21  ;;  %v4881_v21 = vld [vmem:[%s6563_s3 + $0x1e0] ss:$12 sps:$4 sm:$0xff]  }
  0xe3   :  { %4306 = vmatpush3.bf16.msra.mxu0 %v4800_v20 }
  0xe4   :  { %4328 = vmatpush3.bf16.msra.mxu1 %v4802_v22  ;;  %4307 = vmatprep.subr.bf16.mxu0 %v4803_v23  ;;  %v4851_v22 = vld [vmem:[%s6563_s3 + $0x150] ss:$12 sps:$4 sm:$0xff]   ;;  %v4886_v23 = vld [vmem:[%s6563_s3 + $0x1cc] ss:$12 sps:$4 sm:$0xff]  }
  0xe5   :  { %4329 = vmatprep.subr.bf16.mxu1 %v4805_v25  ;;  %v4856_v25 = vld [vmem:[%s6563_s3 + $0x13c] ss:$12 sps:$4 sm:$0xff]  }
  0xe7   :  { %4308 = vmatpush3.bf16.msra.mxu0 %v4804_v27  ;;  %v4884_v27 = vld [vmem:[%s6563_s3 + $0x1c8] ss:$12 sps:$4 sm:$0xff]  }
  0xe8   :  { %4330 = vmatpush3.bf16.msra.mxu1 %v4806_v28  ;;  %4337 = vmatprep.subr.bf16.mxu0 %v4807_v29  ;;  %v4854_v28 = vld [vmem:[%s6563_s3 + $0x138] ss:$12 sps:$4 sm:$0xff]   ;;  %v4889_v29 = vld [vmem:[%s6563_s3 + $0x1b4] ss:$12 sps:$4 sm:$0xff]  }
  0xe9   :  { %4420 = vmatprep.subr.bf16.mxu1 %v5067_v36 }
  0xea   :  { %2107 = vmatmul.mubr.bf16.vlgmr.msra.gmra.mxu0 %v5373_v24  ;;  %v4813_v24 = vld [vmem:[%s6561_s1 + $0x6f0] ss:$20 sps:$4 sm:$0xff]  }
  0xeb   :  { %4338 = vmatpush3.bf16.msra.mxu0 %v4808_v30  ;;  %2147 = vmatmul.mubr.bf16.vlgmr.msra.gmra.mxu1 %v5378_v26  ;;  %v4824_v26 = vld [vmem:[%s6563_s3 + $0xa8] ss:$12 sps:$4 sm:$0xff]   ;;  %v4859_v30 = vld [vmem:[%s6563_s3 + $0x124] ss:$12 sps:$4 sm:$0xff]  }
  0xec   :  { %4339 = vmatprep.subr.bf16.mxu0 %v4809_v31  ;;  %4421 = vmatpush3.bf16.msra.mxu1 %v4823_v32  ;;  %v4887_v31 = vld [vmem:[%s6563_s3 + $0x1b0] ss:$12 sps:$4 sm:$0xff]   ;;  %v4857_v32 = vld [vmem:[%s6563_s3 + $0x120] ss:$12 sps:$4 sm:$0xff]  }
  0xed   :  { %2186 = vmatprep.mubr.bf16.mxu0 %v5491_v3  ;;  %4422 = vmatprep.mubr.msk.bf16.mxu1 %vm5068_vm1, %v5067_v36  ;;  %v4814_v3 = vld [vmem:[%s6561_s1 + $0x5b0] ss:$20 sps:$4 sm:$0xff]  }
  0xee   :  { %2985 = vmatprep.subr.bf16.mxu1 %v4826_v33  ;;  %v4892_v33 = vld [vmem:[%s6563_s3 + $0x19c] ss:$12 sps:$4 sm:$0xff]  }
  0xef   :  { %4340 = vmatpush3.bf16.msra.mxu0 %v4810_v34  ;;  %v4862_v34 = vld [vmem:[%s6563_s3 + $0x10c] ss:$12 sps:$4 sm:$0xff]  }
  0xf0   :  { %4341 = vmatprep.subr.bf16.mxu0 %v4811_v37  ;;  %v4890_v37 = vld [vmem:[%s6563_s3 + $0x198] ss:$12 sps:$4 sm:$0xff]  }
  0xf3   :  { %4342 = vmatpush3.bf16.msra.mxu0 %v4812_v39  ;;  %4423 = vmatmul.mubr.msk.bf16.vlgmr.msra.gmra.mxu1 %vm1742_vm0, %v5406_v38  ;;  %v4835_v38 = vld [vmem:[%s6563_s3 + $0x64] ss:$12 sps:$4 sm:$0xff]   ;;  %v4860_v39 = vld [vmem:[%s6563_s3 + $0x108] ss:$12 sps:$4 sm:$0xff]  }
  0xf4   :  { %4343 = vmatprep.subr.bf16.mxu0 %v4813_v24  ;;  %2986 = vmatpush1.bf16.msra.mxu1 %v4824_v26  ;;  %v4895_v24 = vld [vmem:[%s6563_s3 + $0x184] ss:$12 sps:$4 sm:$0xff]   ;;  %v4865_v26 = vld [vmem:[%s6563_s3 + $0xf4] ss:$12 sps:$4 sm:$0xff]  }
  0xf5   :  { %2987 = vmatprep.subr.bf16.mxu1 %v4829_v40  ;;  %v4893_v40 = vld [vmem:[%s6563_s3 + $0x180] ss:$12 sps:$4 sm:$0xff]  }
  0xf7   :  { %4344 = vmatpush3.bf16.msra.mxu0 %v4814_v3  ;;  %v4863_v3 = vld [vmem:[%s6563_s3 + $0xf0] ss:$12 sps:$4 sm:$0xff]  }
  0xf8   :  { %4345 = vmatprep.subr.bf16.mxu0 %v4815_v41  ;;  %2988 = vmatpush1.bf16.msra.mxu1 %v4827_v42  ;;  %v4898_v41 = vld [vmem:[%s6563_s3 + $0x2ec] ss:$12 sps:$4 sm:$0xff]   ;;  %v4868_v42 = vld [vmem:[%s6563_s3 + $0xdc] ss:$12 sps:$4 sm:$0xff]  }
  0xf9   :  { %2989 = vmatprep.subr.bf16.mxu1 %v4832_v44  ;;  %v4896_v44 = vld [vmem:[%s6563_s3 + $0x2e8] ss:$12 sps:$4 sm:$0xff]  }
  0xfb   :  { %4346 = vmatpush3.bf16.msra.mxu0 %v4816_v45  ;;  %v4866_v45 = vld [vmem:[%s6563_s3 + $0xd8] ss:$12 sps:$4 sm:$0xff]  }
  0xfc   :  { %4347 = vmatprep.subr.bf16.mxu0 %v4817_v47  ;;  %2990 = vmatpush1.bf16.msra.mxu1 %v4830_v48  ;;  %v4901_v47 = vld [vmem:[%s6563_s3 + $0x2d4] ss:$12 sps:$4 sm:$0xff]   ;;  %v4871_v48 = vld [vmem:[%s6563_s3 + $0xc4] ss:$12 sps:$4 sm:$0xff]  }
  0xfd   :  { %2991 = vmatprep.subr.bf16.mxu1 %v4835_v38  ;;  %v4899_v38 = vld [vmem:[%s6563_s3 + $0x2d0] ss:$12 sps:$4 sm:$0xff]  }
  0xff   :  { %4348 = vmatpush3.bf16.msra.mxu0 %v4818_v49  ;;  %v4869_v49 = vld [vmem:[%s6563_s3 + $0xc0] ss:$12 sps:$4 sm:$0xff]  }
 0x100   :  { %4349 = vmatprep.subr.bf16.mxu0 %v4819_v50  ;;  %2992 = vmatpush1.bf16.msra.mxu1 %v4833_v51  ;;  %v4904_v50 = vld [vmem:[%s6563_s3 + $0x2bc] ss:$12 sps:$4 sm:$0xff]   ;;  %v4902_v51 = vld [vmem:[%s6563_s3 + $0x2b8] ss:$12 sps:$4 sm:$0xff]  }
 0x101   :  { %2993 = vmatprep.subr.bf16.mxu1 %v4838_v53  ;;  %v4907_v53 = vld [vmem:[%s6563_s3 + $0x2a4] ss:$12 sps:$4 sm:$0xff]  }
 0x102   :  { %v5997_v59 = vpop.f32.mrf.mxu0 }
 0x103   :  { %4350 = vmatpush3.bf16.msra.mxu0 %v4820_v54  ;;  %v6002_v61 = vpop.f32.mrf.mxu1  ;;  %v4905_v54 = vld [vmem:[%s6563_s3 + $0x2a0] ss:$12 sps:$4 sm:$0xff]  }
 0x104   :  { %v6007_v63 = vpop.f32.mrf.mxu0  ;;  %4351 = vmatprep.subr.bf16.mxu0 %v4821_v55  ;;  %2994 = vmatpush1.bf16.msra.mxu1 %v4836_v56  ;;  %v4910_v55 = vld [vmem:[%s6563_s3 + $0x28c] ss:$12 sps:$4 sm:$0xff]   ;;  %v6149_v56 = vsub.s32 0, %v5268_v46 }
 0x105   :  { %v6012_v1 = vpop.f32.mrf.mxu1  ;;  %2995 = vmatprep.subr.bf16.mxu1 %v4841_v57  ;;  %v6154_v57 = vld [vmem:[%s6562_s2] sm:$0x1f] }
 0x106   :  { %v1784_v52 = vpop.f32.mrf.mxu0 }
 0x107   :  { %4352 = vmatpush3.bf16.msra.mxu0 %v4822_v58  ;;  %v1825_v5 = vpop.f32.mrf.mxu1  ;;  %v6157_v58 = vsub.s32 1, %v5268_v46 }
 0x108   :  { %v1785_v6 = vpop.f32.mrf.mxu0  ;;  %2996 = vmatpush1.bf16.msra.mxu1 %v4839_v60  ;;  %3026 = vmatprep.subr.bf16.mxu0 %v4874_v0  ;;  %v4908_v60 = vld [vmem:[%s6563_s3 + $0x288] ss:$12 sps:$4 sm:$0xff]  }
 0x109   :  { %v1826_v9 = vpop.f32.mrf.mxu1  ;;  %2997 = vmatprep.subr.bf16.mxu1 %v4844_v62  ;;  %v4938_v62 = vld [vmem:[%s6563_s3 + $0x34c] ss:$12 sps:$4 sm:$0xff]   ;;  %v4913_v0 = vld [vmem:[%s6563_s3 + $0x274] ss:$12 sps:$4 sm:$0xff]   ;;  %v450_v52 = vrot.slane %v6154_v57, %v6157_v58  ;;  %v4916_v5 = vld [vmem:[%s6563_s3 + $0x25c] ss:$12 sps:$4 sm:$0xff]  }
 0x10a   :  { %2187 = vmatmul.mubr.bf16.vlgmr.msra.gmra.mxu0 %v5592_v43  ;;  %v4878_v43 = vld [vmem:[%s6563_s3 + $0x1f8] ss:$12 sps:$4 sm:$0xff]  }
 0x10b   :  { %v6033_v12 = vpop.f32.mrf.mxu1  ;;  %3027 = vmatpush1.bf16.msra.mxu0 %v4872_v2  ;;  %v446_v2 = vrot.slane %v6154_v57, %v6149_v56  ;;  %v4919_v9 = vld [vmem:[%s6563_s3 + $0x244] ss:$12 sps:$4 sm:$0xff]  }
 0x10c   :  { %2998 = vmatpush1.bf16.msra.mxu1 %v4842_v4  ;;  %3028 = vmatprep.subr.bf16.mxu0 %v4877_v7  ;;  %v4911_v4 = vld [vmem:[%s6563_s3 + $0x270] ss:$12 sps:$4 sm:$0xff]   ;;  %v4914_v7 = vld [vmem:[%s6563_s3 + $0x258] ss:$12 sps:$4 sm:$0xff]  }
 0x10d   :  { %v6041_v15 = vpop.f32.mrf.mxu1  ;;  %2999 = vmatprep.subr.bf16.mxu1 %v4847_v8  ;;  %v1781_v6 = vadd.f32 %v5997_v59, %v446_v2  ;;  %v1783_v8 = vadd.f32 %v6007_v63, %v450_v52  ;;  %v4917_v59 = vld [vmem:[%s6563_s3 + $0x240] ss:$12 sps:$4 sm:$0xff]  }
 0x10f   :  { %v1907_v17 = vpop.f32.mrf.mxu1  ;;  %3029 = vmatpush1.bf16.msra.mxu0 %v4875_v10  ;;  %v1822_v10 = vadd.f32 %v6002_v61, %v1781_v6 }
 0x110   :  { %3000 = vmatpush1.bf16.msra.mxu1 %v4845_v11  ;;  %3030 = vmatprep.subr.bf16.mxu0 %v4880_v14 }
 0x111   :  { %v1908_v20 = vpop.f32.mrf.mxu1  ;;  %3001 = vmatprep.subr.bf16.mxu1 %v4850_v13  ;;  %v1824_v13 = vadd.f32 %v6012_v1, %v1783_v8  ;;  %v4921_v8 = vld [vmem:[%s6563_s3 + $0x230] ss:$12 sps:$4 sm:$0xff]  }
 0x113   :  { %3031 = vmatpush1.bf16.msra.mxu0 %v4878_v43  ;;  %v4920_v43 = vld [vmem:[%s6563_s3 + $0x2f0] ss:$12 sps:$4 sm:$0xff]  }
 0x114   :  { %3002 = vmatpush2.bf16.msra.mxu1 %v4848_v16  ;;  %3032 = vmatprep.subr.bf16.mxu0 %v4883_v19 }
 0x115   :  { %3003 = vmatprep.subr.bf16.mxu1 %v4853_v18 }
 0x117   :  { %3033 = vmatpush1.bf16.msra.mxu0 %v4881_v21 }
 0x118   :  { %3004 = vmatpush2.bf16.msra.mxu1 %v4851_v22  ;;  %3034 = vmatprep.subr.bf16.mxu0 %v4886_v23  ;;  %v4936_v23 = vld [vmem:[%s6563_s3 + $0x348] ss:$12 sps:$4 sm:$0xff]  }
 0x119   :  { %3005 = vmatprep.subr.bf16.mxu1 %v4856_v25 }
 0x11b   :  { %3035 = vmatpush1.bf16.msra.mxu0 %v4884_v27 }
 0x11c   :  { %3006 = vmatpush2.bf16.msra.mxu1 %v4854_v28  ;;  %3036 = vmatprep.subr.bf16.mxu0 %v4889_v29  ;;  %v4939_v28 = vld [vmem:[%s6563_s3 + $0x330] ss:$12 sps:$4 sm:$0xff]  }
 0x11d   :  { %3007 = vmatprep.subr.bf16.mxu1 %v4859_v30  ;;  %v4944_v29 = vld [vmem:[%s6563_s3 + $0x31c] ss:$12 sps:$4 sm:$0xff]  }
 0x11f   :  { %3037 = vmatpush1.bf16.msra.mxu0 %v4887_v31  ;;  %v4942_v31 = vld [vmem:[%s6563_s3 + $0x318] ss:$12 sps:$4 sm:$0xff]  }
 0x120   :  { %3008 = vmatpush2.bf16.msra.mxu1 %v4857_v32  ;;  %3038 = vmatprep.subr.bf16.mxu0 %v4892_v33  ;;  %v4947_v32 = vld [vmem:[%s6563_s3 + $0x304] ss:$12 sps:$4 sm:$0xff]   ;;  %v4945_v33 = vld [vmem:[%s6563_s3 + $0x300] ss:$12 sps:$4 sm:$0xff]  }
 0x121   :  { %3009 = vmatprep.subr.bf16.mxu1 %v4862_v34  ;;  %v4948_v34 = vld [vmem:[%s6563_s3 + $0x170] ss:$12 sps:$4 sm:$0xff]  }
 0x123   :  { %3039 = vmatpush1.bf16.msra.mxu0 %v4890_v37  ;;  %v453_v37 = vsub.s32 2, %v5268_v46 }
 0x124   :  { %3010 = vmatpush2.bf16.msra.mxu1 %v4860_v39  ;;  %3040 = vmatprep.subr.bf16.mxu0 %v4895_v24  ;;  %v457_v39 = vsub.s32 3, %v5268_v46 }
 0x125   :  { %3011 = vmatprep.subr.bf16.mxu1 %v4865_v26  ;;  %v454_v26 = vrot.slane %v6154_v57, %v453_v37 }
 0x127   :  { %3041 = vmatpush1.bf16.msra.mxu0 %v4893_v40 }
 0x128   :  { %3012 = vmatpush2.bf16.msra.mxu1 %v4863_v3  ;;  %3042 = vmatprep.subr.bf16.mxu0 %v4898_v41  ;;  %v458_v3 = vrot.slane %v6154_v57, %v457_v39 }
 0x129   :  { %3013 = vmatprep.subr.bf16.mxu1 %v4868_v42 }
 0x12b   :  { %3043 = vmatpush2.bf16.msra.mxu0 %v4896_v44 }
 0x12c   :  { %3014 = vmatpush2.bf16.msra.mxu1 %v4866_v45  ;;  %3044 = vmatprep.subr.bf16.mxu0 %v4901_v47 }
 0x12d   :  { %3015 = vmatprep.subr.bf16.mxu1 %v4871_v48 }
 0x12f   :  { %3045 = vmatpush2.bf16.msra.mxu0 %v4899_v38 }
 0x130   :  { %3016 = vmatpush2.bf16.msra.mxu1 %v4869_v49  ;;  %3046 = vmatprep.subr.bf16.mxu0 %v4904_v50 }
 0x131   :  { %3075 = vmatprep.subr.bf16.mxu1 %v4938_v62 }
 0x133   :  { %3047 = vmatpush2.bf16.msra.mxu0 %v4902_v51 }
 0x134   :  { %3048 = vmatprep.subr.bf16.mxu0 %v4907_v53 }
 0x137   :  { %3049 = vmatpush2.bf16.msra.mxu0 %v4905_v54 }
 0x138   :  { %3050 = vmatprep.subr.bf16.mxu0 %v4910_v55 }
 0x13b   :  { %3051 = vmatpush2.bf16.msra.mxu0 %v4908_v60 }
 0x13c   :  { %3052 = vmatprep.subr.bf16.mxu0 %v4913_v0 }
 0x13f   :  { %3053 = vmatpush2.bf16.msra.mxu0 %v4911_v4 }
 0x140   :  { %3054 = vmatprep.subr.bf16.mxu0 %v4916_v5 }
 0x142   :  { %v1862_v11 = vpop.f32.mrf.mxu0 }
 0x143   :  { %v1863_v14 = vadd.f32 %v1862_v11, %v1822_v10  ;;  %3055 = vmatpush2.bf16.msra.mxu0 %v4914_v7  ;;  %v4923_v10 = vld [vmem:[%s6563_s3 + $0x218] ss:$12 sps:$4 sm:$0xff]   ;;  %v4924_v11 = vld [vmem:[%s6563_s3 + $0x2c0] ss:$12 sps:$4 sm:$0xff]  }
 0x144   :  { %v1864_v63 = vpop.f32.mrf.mxu0  ;;  %3056 = vmatprep.subr.bf16.mxu0 %v4919_v9  ;;  %v4922_v9 = vld [vmem:[%s6563_s3 + $0x2d8] ss:$12 sps:$4 sm:$0xff]  }
 0x145   :  { %v1904_v16 = vadd.f32 %v6033_v12, %v1863_v14  ;;  %v1865_v17 = vadd.f32 %v1864_v63, %v1824_v13  ;;  %v4941_v12 = vld [vmem:[%s6563_s3 + $0x334] ss:$12 sps:$4 sm:$0xff]   ;;  %v4928_v63 = vld [vmem:[%s6563_s3 + $0x290] ss:$12 sps:$4 sm:$0xff]  }
 0x146   :  { %v1866_v18 = vpop.f32.mrf.mxu0  ;;  %v4925_v13 = vld [vmem:[%s6563_s3 + $0x200] ss:$12 sps:$4 sm:$0xff]   ;;  %v4926_v14 = vld [vmem:[%s6563_s3 + $0x2a8] ss:$12 sps:$4 sm:$0xff]  }
 0x147   :  { %v1906_v61 = vadd.f32 %v6041_v15, %v1865_v17  ;;  %3057 = vmatpush2.bf16.msra.mxu0 %v4917_v59  ;;  %v2234_v1 = vmax.f32 %v1904_v16, 0.0  ;;  %v4927_v59 = vld [vmem:[%s6563_s3 + $0x1e8] ss:$12 sps:$4 sm:$0xff]   ;;  %v4930_v16 = vld [vmem:[%s6563_s3 + $0x278] ss:$12 sps:$4 sm:$0xff]  }
 0x148   :  { %v1867_v19 = vpop.f32.mrf.mxu0  ;;  %4383 = vmatprep.subr.bf16.mxu0 %v4920_v43  ;;  %v4929_v43 = vld [vmem:[%s6563_s3 + $0x1d0] ss:$12 sps:$4 sm:$0xff]   ;;  %v4931_v17 = vld [vmem:[%s6563_s3 + $0x1b8] ss:$12 sps:$4 sm:$0xff]   ;;  %v4932_v18 = vld [vmem:[%s6563_s3 + $0x260] ss:$12 sps:$4 sm:$0xff]  }
 0x149   :  { %v2235_v20 = vmax.f32 %v1906_v61, 0.0  ;;  %v6201_v25 = vpack.c.bf16 %v2234_v1, %v2234_v1 }
 0x14b   :  { %v6196_v21 = vpack.c.bf16 %v2235_v20, %v2235_v20  ;;  %v1944_v22 = vpop.f32.mrf.mxu1  ;;  %v4933_v20 = vld [vmem:[%s6563_s3 + $0x1a0] ss:$12 sps:$4 sm:$0xff]  }
 0x14c   :  { %v1945_v42 = vadd.f32 %v1944_v22, %v454_v26 }
 0x14d   :  { %3017 = vmatprep.mubr.bf16.mxu1 %v6196_v21  ;;  %v1946_v15 = vpop.f32.mrf.mxu1 }
 0x14e   :  { %3018 = vmatmul.mubr.bf16.vlgmr.msra.gmra.mxu1 %v6201_v25  ;;  %v1947_v45 = vadd.f32 %v1946_v15, %v458_v3 }
 0x14f   :  { %v1948_v27 = vpop.f32.mrf.mxu1  ;;  %3076 = vmatpush1.bf16.msra.mxu1 %v4936_v23  ;;  %3099 = vmatprep.mubr.bf16.mxu1 %v5066_v35  ;;  %v4934_v23 = vld [vmem:[%s6563_s3 + $0x248] ss:$12 sps:$4 sm:$0xff]  }
 0x150   :  { %3077 = vmatprep.subr.bf16.mxu1 %v4941_v12 }
 0x151   :  { %v1949_v30 = vpop.f32.mrf.mxu1 }
 0x153   :  { %3078 = vmatpush1.bf16.msra.mxu1 %v4939_v28  ;;  %v4935_v28 = vld [vmem:[%s6563_s3 + $0x188] ss:$12 sps:$4 sm:$0xff]  }
 0x154   :  { %3079 = vmatprep.subr.bf16.mxu1 %v4944_v29 }
 0x157   :  { %3080 = vmatpush1.bf16.msra.mxu1 %v4942_v31 }
 0x158   :  { %3081 = vmatprep.subr.bf16.mxu1 %v4947_v32 }
 0x15b   :  { %3082 = vmatpush1.bf16.msra.mxu1 %v4945_v33 }
 0x15c   :  { %4361 = vmatprep.subr.bf16.mxu1 %v4948_v34  ;;  %v461_v34 = vsub.s32 4, %v5268_v46  ;;  %v5023_v46 = vld [vmem:[%s6567_s7 + $0x30] sm:$0xff]  }
 0x15e   :  { %v462_v39 = vrot.slane %v6154_v57, %v461_v34  ;;  %v4950_v57 = vld [vmem:[%s6563_s3 + $0x158] ss:$12 sps:$4 sm:$0xff]  }
 0x182   :  { %v1985_v24 = vpop.f32.mrf.mxu0 }
 0x183   :  { %v1986_v47 = vadd.f32 %v1985_v24, %v1945_v42 }
 0x184   :  { %v1987_v40 = vpop.f32.mrf.mxu0 }
 0x185   :  { %v1988_v49 = vadd.f32 %v1987_v40, %v1947_v45 }
 0x186   :  { %v1989_v41 = vpop.f32.mrf.mxu0 }
 0x188   :  { %v1990_v44 = vpop.f32.mrf.mxu0 }
 0x18a   :  { %v2067_v48 = vpop.f32.mrf.mxu0 }
 0x18b   :  { %v2026_v38 = vpop.f32.mrf.mxu1 }
 0x18c   :  { %v2027_v50 = vadd.f32 %v2026_v38, %v1986_v47  ;;  %v2069_v51 = vpop.f32.mrf.mxu0 }
 0x18d   :  { %v2028_v53 = vpop.f32.mrf.mxu1 }
 0x18e   :  { %v2068_v54 = vadd.f32 %v2067_v48, %v2027_v50  ;;  %v2029_v55 = vadd.f32 %v2028_v53, %v1988_v49  ;;  %v2071_v60 = vpop.f32.mrf.mxu0  ;;  %v4949_v50 = vld [vmem:[%s6563_s3 + $0xb0] ss:$12 sps:$4 sm:$0xff]   ;;  %v4951_v53 = vld [vmem:[%s6563_s3 + $0x98] ss:$12 sps:$4 sm:$0xff]  }
 0x18f   :  { %v2030_v62 = vpop.f32.mrf.mxu1  ;;  %v4954_v60 = vld [vmem:[%s6563_s3 + $0x128] ss:$12 sps:$4 sm:$0xff]  }
 0x190   :  { %v2070_v0 = vadd.f32 %v2069_v51, %v2029_v55  ;;  %v2072_v2 = vpop.f32.mrf.mxu0  ;;  %v2236_v52 = vmax.f32 %v2068_v54, 0.0  ;;  %v4952_v54 = vld [vmem:[%s6563_s3 + $0x140] ss:$12 sps:$4 sm:$0xff]   ;;  %v4970_v62 = vld [vmem:[%s6565_s5 + $0x74] ss:$8 sps:$4 sm:$0xff]  }
 0x191   :  { %v2031_v4 = vpop.f32.mrf.mxu1  ;;  %v4953_v55 = vld [vmem:[%s6563_s3 + $0x80] ss:$12 sps:$4 sm:$0xff]   ;;  %v4955_v2 = vld [vmem:[%s6563_s3 + $0x68] ss:$12 sps:$4 sm:$0xff]  }
 0x192   :  { %v2237_v5 = vmax.f32 %v2070_v0, 0.0  ;;  %v2241_v7 = vpack.c.bf16 %v2236_v52, %v2236_v52  ;;  %v4973_v0 = vld [vmem:[%s6565_s5 + $0x64] ss:$8 sps:$4 sm:$0xff]   ;;  %v4971_v52 = vld [vmem:[%s6565_s5 + $0x60] ss:$8 sps:$4 sm:$0xff]  }
 0x193   :  { %v4956_v4 = vld [vmem:[%s6563_s3 + $0x110] ss:$12 sps:$4 sm:$0xff]  }
 0x194   :  { %v2242_v6 = vpack.c.bf16 %v2237_v5, %v2237_v5  ;;  %v4976_v5 = vld [vmem:[%s6565_s5 + $0x54] ss:$8 sps:$4 sm:$0xff]  }
 0x196   :  { %3058 = vmatprep.mubr.bf16.mxu0 %v2242_v6 }
 0x197   :  { %3059 = vmatmul.mubr.bf16.vlgmr.msra.gmra.mxu0 %v2241_v7 }
 0x198   :  { %4384 = vmatpush3.bf16.msra.mxu0 %v4921_v8  ;;  %3180 = vmatprep.mubr.bf16.mxu0 %v2242_v6  ;;  %v4957_v6 = vld [vmem:[%s6563_s3 + $0x50] ss:$12 sps:$4 sm:$0xff]  }
 0x199   :  { %4385 = vmatprep.subr.bf16.mxu0 %v4922_v9  ;;  %v4974_v8 = vld [vmem:[%s6565_s5 + $0x50] ss:$8 sps:$4 sm:$0xff]   ;;  %v4979_v9 = vld [vmem:[%s6565_s5 + $0x44] ss:$8 sps:$4 sm:$0xff]  }
 0x19c   :  { %4386 = vmatpush3.bf16.msra.mxu0 %v4923_v10  ;;  %v4959_v10 = vld [vmem:[%s6563_s3 + $0x38] ss:$12 sps:$4 sm:$0xff]  }
 0x19d   :  { %4387 = vmatprep.subr.bf16.mxu0 %v4924_v11  ;;  %v4977_v11 = vld [vmem:[%s6565_s5 + $0x40] ss:$8 sps:$4 sm:$0xff]  }
 0x1a0   :  { %4388 = vmatpush3.bf16.msra.mxu0 %v4925_v13  ;;  %v4960_v13 = vld [vmem:[%s6563_s3 + $0xe0] ss:$12 sps:$4 sm:$0xff]  }
 0x1a1   :  { %4389 = vmatprep.subr.bf16.mxu0 %v4926_v14  ;;  %v4982_v14 = vld [vmem:[%s6565_s5 + $0x34] ss:$8 sps:$4 sm:$0xff]  }
 0x1a4   :  { %4390 = vmatpush3.bf16.msra.mxu0 %v4927_v59  ;;  %v4961_v59 = vld [vmem:[%s6563_s3 + $0x20] ss:$12 sps:$4 sm:$0xff]  }
 0x1a5   :  { %4391 = vmatprep.subr.bf16.mxu0 %v4928_v63  ;;  %v4980_v63 = vld [vmem:[%s6565_s5 + $0x30] ss:$8 sps:$4 sm:$0xff]  }
 0x1a8   :  { %4392 = vmatpush3.bf16.msra.mxu0 %v4929_v43  ;;  %v4962_v43 = vld [vmem:[%s6563_s3 + $0xc8] ss:$12 sps:$4 sm:$0xff]  }
 0x1a9   :  { %4393 = vmatprep.subr.bf16.mxu0 %v4930_v16  ;;  %v4963_v16 = vld [vmem:[%s6563_s3 + $0x8] ss:$12 sps:$4 sm:$0xff]  }
 0x1aa   :  { %v4309_v61 = vpop.f32.mrf.mxu0 }
 0x1ab   :  { %v4331_v1 = vpop.f32.mrf.mxu1 }
 0x1ac   :  { %4394 = vmatpush3.bf16.msra.mxu0 %v4931_v17  ;;  %v4310_v19 = vpop.f32.mrf.mxu0  ;;  %v4964_v17 = vld [vmem:[%s6563_s3 + $0x350] ss:$12 sps:$4 sm:$0xff]  }
 0x1ad   :  { %4395 = vmatprep.subr.bf16.mxu0 %v4932_v18  ;;  %v4332_v22 = vpop.f32.mrf.mxu1  ;;  %v4311_v24 = vadd.f32 %v4310_v19, %v4309_v61  ;;  %v4985_v18 = vld [vmem:[%s6565_s5 + $0x24] ss:$8 sps:$4 sm:$0xff]   ;;  %v4983_v61 = vld [vmem:[%s6565_s5 + $0x20] ss:$8 sps:$4 sm:$0xff]   ;;  %v4988_v19 = vld [vmem:[%s6565_s5 + $0x14] ss:$8 sps:$4 sm:$0xff]  }
 0x1ae   :  { %v4312_v12 = vpop.f32.mrf.mxu0  ;;  %v4333_v40 = vadd.f32 %v4332_v22, %v4331_v1  ;;  %v4965_v1 = vld [vmem:[%s6563_s3 + $0x338] ss:$12 sps:$4 sm:$0xff]   ;;  %v4989_v22 = vld [vmem:[%s6565_s5] ss:$8 sps:$4 sm:$0xff]  }
 0x1af   :  { %v4334_v15 = vpop.f32.mrf.mxu1  ;;  %v2109_v26 = vadd.f32 %v4311_v24, %v462_v39  ;;  %v4994_v12 = vld [vmem:[%s6565_s5 + $0xf4] ss:$8 sps:$4 sm:$0xff]  }
 0x1b0   :  { %4396 = vmatpush3.bf16.msra.mxu0 %v4933_v20  ;;  %v4313_v27 = vpop.f32.mrf.mxu0  ;;  %v4966_v20 = vld [vmem:[%s6563_s3 + $0x320] ss:$12 sps:$4 sm:$0xff]   ;;  %v4967_v15 = vld [vmem:[%s6563_s3 + $0x308] ss:$12 sps:$4 sm:$0xff]  }
 0x1b1   :  { %4397 = vmatprep.subr.bf16.mxu0 %v4934_v23  ;;  %v4335_v29 = vpop.f32.mrf.mxu1  ;;  %v2149_v42 = vadd.f32 %v4333_v40, %v2109_v26  ;;  %v4991_v23 = vld [vmem:[%s6565_s5 + $0x4] ss:$8 sps:$4 sm:$0xff]   ;;  %v4992_v27 = vld [vmem:[%s6565_s5 + $0xf0] ss:$8 sps:$4 sm:$0xff]   ;;  %v5006_v39 = vld [vmem:[%s6565_s5 + $0xb4] ss:$8 sps:$4 sm:$0xff]  }
 0x1b2   :  { %v4995_v29 = vld [vmem:[%s6565_s5 + $0xe0] ss:$8 sps:$4 sm:$0xff]   ;;  %v5004_v26 = vld [vmem:[%s6565_s5 + $0xb0] ss:$8 sps:$4 sm:$0xff]  }
 0x1b3   :  { %v2228_v30 = vpop.f32.mrf.mxu1 }
 0x1b4   :  { %4398 = vmatpush3.bf16.msra.mxu0 %v4935_v28  ;;  %v4997_v28 = vld [vmem:[%s6565_s5 + $0xe4] ss:$8 sps:$4 sm:$0xff]  }
 0x1b5   :  { %v4424_v31 = vpop.f32.mrf.mxu1  ;;  %3466 = vmatprep.subr.bf16.mxu0 %v4970_v62 }
 0x1b6   :  { %v4998_v31 = vld [vmem:[%s6565_s5 + $0xd0] ss:$8 sps:$4 sm:$0xff]  }
 0x1b7   :  { %3181 = vmatmul.mubr.bf16.vlgmr.msra.gmra.mxu0 %v2241_v7  ;;  %v2231_v32 = vpop.f32.mrf.mxu1  ;;  %v4958_v7 = vld [vmem:[%s6563_s3 + $0xf8] ss:$12 sps:$4 sm:$0xff]  }
 0x1b8   :  { %v5003_v32 = vld [vmem:[%s6565_s5 + $0xc4] ss:$8 sps:$4 sm:$0xff]  }
 0x1b9   :  { %v4425_v33 = vpop.f32.mrf.mxu1 }
 0x1ba   :  { %v5001_v33 = vld [vmem:[%s6565_s5 + $0xc0] ss:$8 sps:$4 sm:$0xff]  }
 0x1ca   :  { %v4353_v3 = vpop.f32.mrf.mxu0 }
 0x1cc   :  { %v4354_v41 = vpop.f32.mrf.mxu0 }
 0x1cd   :  { %v4355_v44 = vadd.f32 %v4354_v41, %v4353_v3  ;;  %v5009_v3 = vld [vmem:[%s6565_s5 + $0xa4] ss:$8 sps:$4 sm:$0xff]  }
 0x1ce   :  { %v4356_v45 = vpop.f32.mrf.mxu0 }
 0x1cf   :  { %v2189_v47 = vadd.f32 %v4355_v44, %v2149_v42  ;;  %v5007_v42 = vld [vmem:[%s6565_s5 + $0xa0] ss:$8 sps:$4 sm:$0xff]   ;;  %v5012_v44 = vld [vmem:[%s6565_s5 + $0x94] ss:$8 sps:$4 sm:$0xff]   ;;  %v5010_v45 = vld [vmem:[%s6565_s5 + $0x90] ss:$8 sps:$4 sm:$0xff]  }
 0x1d0   :  { %v4357_v48 = vpop.f32.mrf.mxu0 }
 0x1d1   :  { %v2229_v38 = vadd.f32 %v2228_v30, %v2189_v47  ;;  %v5000_v30 = vld [vmem:[%s6565_s5 + $0xd4] ss:$8 sps:$4 sm:$0xff]   ;;  %v5015_v47 = vld [vmem:[%s6565_s5 + $0x84] ss:$8 sps:$4 sm:$0xff]   ;;  %v5013_v48 = vld [vmem:[%s6565_s5 + $0x80] ss:$8 sps:$4 sm:$0xff]  }
 0x1d3   :  { %v2238_v49 = vmax.f32 %v2229_v38, 0.0  ;;  %v5016_v38 = vld [vmem:[%s6565_s5 + $0x110] ss:$8 sps:$4 sm:$0xff]  }
 0x1d5   :  { %v6283_v51 = vpack.c.bf16 %v2238_v49, %v2238_v49  ;;  %v5018_v49 = vld [vmem:[%s6565_s5 + $0x114] ss:$8 sps:$4 sm:$0xff]  }
 0x1d7   :  { %4231 = vmatmul.mubr.msk.bf16.vlgmr.msra.gmra.mxu1 %vm2981_vm2, %v6283_v51 }
 0x1d8   :  { %4362 = vmatpush3.bf16.msra.mxu1 %v4949_v50  ;;  %3140 = vmatprep.mubr.bf16.mxu1 %v6196_v21  ;;  %v4968_v21 = vld [vmem:[%s6565_s5 + $0x70] ss:$8 sps:$4 sm:$0xff]   ;;  %v5021_v50 = vld [vmem:[%s6565_s5 + $0x104] ss:$8 sps:$4 sm:$0xff]  }
 0x1d9   :  { %4363 = vmatprep.subr.bf16.mxu1 %v4950_v57  ;;  %3467 = vmatpush1.bf16.msra.mxu0 %v4968_v21  ;;  %v2388_v57 = vld [vmem:[%s6564_s4] sm:$0x7] }
 0x1da   :  { %3468 = vmatprep.subr.bf16.mxu0 %v4973_v0 }
 0x1dc   :  { %4364 = vmatpush3.bf16.msra.mxu1 %v4951_v53  ;;  %v2393_v53 = vrot.slane %v2388_v57, %v6149_v56 }
 0x1dd   :  { %4365 = vmatprep.subr.bf16.mxu1 %v4952_v54  ;;  %3469 = vmatpush1.bf16.msra.mxu0 %v4971_v52 }
 0x1de   :  { %3470 = vmatprep.subr.bf16.mxu0 %v4976_v5 }
 0x1e0   :  { %4366 = vmatpush3.bf16.msra.mxu1 %v4953_v55 }
 0x1e1   :  { %4367 = vmatprep.subr.bf16.mxu1 %v4954_v60  ;;  %3471 = vmatpush1.bf16.msra.mxu0 %v4974_v8  ;;  %v2397_v8 = vrot.slane %v2388_v57, %v6157_v58 }
 0x1e2   :  { %3472 = vmatprep.subr.bf16.mxu0 %v4979_v9 }
 0x1e4   :  { %4368 = vmatpush3.bf16.msra.mxu1 %v4955_v2 }
 0x1e5   :  { %4369 = vmatprep.subr.bf16.mxu1 %v4956_v4  ;;  %3473 = vmatpush1.bf16.msra.mxu0 %v4977_v11 }
 0x1e6   :  { %3474 = vmatprep.subr.bf16.mxu0 %v4982_v14 }
 0x1e8   :  { %4370 = vmatpush3.bf16.msra.mxu1 %v4957_v6 }
 0x1e9   :  { %4371 = vmatprep.subr.bf16.mxu1 %v4958_v7  ;;  %3475 = vmatpush1.bf16.msra.mxu0 %v4980_v63 }
 0x1ea   :  { %3476 = vmatprep.subr.bf16.mxu0 %v4985_v18 }
 0x1ec   :  { %4372 = vmatpush3.bf16.msra.mxu1 %v4959_v10 }
 0x1ed   :  { %4373 = vmatprep.subr.bf16.mxu1 %v4960_v13  ;;  %3477 = vmatpush1.bf16.msra.mxu0 %v4983_v61 }
 0x1ee   :  { %3478 = vmatprep.subr.bf16.mxu0 %v4988_v19 }
 0x1f0   :  { %4374 = vmatpush3.bf16.msra.mxu1 %v4961_v59 }
 0x1f1   :  { %4375 = vmatprep.subr.bf16.mxu1 %v4962_v43 }
 0x1f4   :  { %4376 = vmatpush3.bf16.msra.mxu1 %v4963_v16 }
 0x1f5   :  { %4426 = vmatprep.subr.bf16.mxu1 %v5067_v36 }
 0x1f7   :  { %3141 = vmatmul.mubr.bf16.vlgmr.msra.gmra.mxu1 %v6201_v25  ;;  %v4986_v25 = vld [vmem:[%s6565_s5 + $0x10] ss:$8 sps:$4 sm:$0xff]  }
 0x1f8   :  { %4427 = vmatpush3.bf16.msra.mxu1 %v4964_v17  ;;  %4434 = vmatprep.mubr.msk.bf16.mxu1 %vm5068_vm1, %v5067_v36 }
 0x1f9   :  { %4428 = vmatprep.subr.bf16.mxu1 %v5067_v36  ;;  %3479 = vmatpush1.bf16.msra.mxu0 %v4986_v25 }
 0x1fa   :  { %3480 = vmatprep.subr.bf16.mxu0 %v4991_v23 }
 0x1fc   :  { %4429 = vmatpush3.bf16.msra.mxu1 %v4965_v1 }
 0x1fd   :  { %4430 = vmatprep.subr.bf16.mxu1 %v5067_v36  ;;  %3481 = vmatpush1.bf16.msra.mxu0 %v4989_v22 }
 0x1fe   :  { %3482 = vmatprep.subr.bf16.mxu0 %v4994_v12 }
 0x200   :  { %4431 = vmatpush3.bf16.msra.mxu1 %v4966_v20  ;;  %v2401_v20 = vrot.slane %v2388_v57, %v453_v37  ;;  %v5024_v37 = vld [vmem:[%s6567_s7 + $0x28] sm:$0xff]  }
 0x201   :  { %4432 = vmatprep.subr.bf16.mxu1 %v5067_v36  ;;  %3483 = vmatpush2.bf16.msra.mxu0 %v4992_v27 }
 0x202   :  { %3484 = vmatprep.subr.bf16.mxu0 %v4997_v28 }
 0x204   :  { %4433 = vmatpush3.bf16.msra.mxu1 %v4967_v15 }
 0x205   :  { %3485 = vmatpush2.bf16.msra.mxu0 %v4995_v29  ;;  %3519 = vmatprep.subr.bf16.mxu1 %v5018_v49 }
 0x206   :  { %3486 = vmatprep.subr.bf16.mxu0 %v5000_v30 }
 0x207   :  { %4435 = vmatmul.mubr.msk.bf16.vlgmr.msra.gmra.mxu1 %vm2981_vm2, %v6283_v51  ;;  %v5019_v51 = vld [vmem:[%s6565_s5 + $0x100] ss:$8 sps:$4 sm:$0xff]  }
 0x208   :  { %3539 = vmatprep.mubr.bf16.mxu1 %v5066_v35  ;;  %3520 = vmatpush1.bf16.msra.mxu1 %v5016_v38 }
 0x209   :  { %3487 = vmatpush2.bf16.msra.mxu0 %v4998_v31  ;;  %3521 = vmatprep.subr.bf16.mxu1 %v5021_v50 }
 0x20a   :  { %3488 = vmatprep.subr.bf16.mxu0 %v5003_v32 }
 0x20c   :  { %3522 = vmatpush1.bf16.msra.mxu1 %v5019_v51 }
 0x20d   :  { %3489 = vmatpush2.bf16.msra.mxu0 %v5001_v33  ;;  %3634 = vmatprep.subr.bf16.mxu1 %v5066_v35  ;;  %v5022_v33 = vld [vmem:[%s6567_s7 + $0x38] sm:$0xff]  }
 0x20e   :  { %v3019_v34 = vpop.f32.mrf.mxu1  ;;  %3490 = vmatprep.subr.bf16.mxu0 %v5006_v39  ;;  %v5026_v39 = vld [vmem:[%s6567_s7 + $0x18] sm:$0xff]  }
 0x20f   :  { %v3020_v54 = vadd.f32 %v3019_v34, %v2393_v53  ;;  %v5025_v34 = vld [vmem:[%s6567_s7 + $0x20] sm:$0xff]  }
 0x210   :  { %v3021_v24 = vpop.f32.mrf.mxu1 }
 0x211   :  { %3491 = vmatpush2.bf16.msra.mxu0 %v5004_v26  ;;  %v3022_v7 = vadd.f32 %v3021_v24, %v2397_v8  ;;  %v5027_v24 = vld [vmem:[%s6567_s7 + $0x10] sm:$0xff]   ;;  %v5028_v26 = vld [vmem:[%s6567_s7 + $0x8] sm:$0xff]  }
 0x212   :  { %v3023_v40 = vpop.f32.mrf.mxu1  ;;  %3492 = vmatprep.subr.bf16.mxu0 %v5009_v3  ;;  %v5030_v3 = vld [vmem:[%s6567_s7 + $0x40] sm:$0xff]  }
 0x213   :  { %v5029_v40 = vld [vmem:[%s6567_s7] sm:$0xff]  }
 0x214   :  { %v3024_v41 = vpop.f32.mrf.mxu1 }
 0x215   :  { %3493 = vmatpush2.bf16.msra.mxu0 %v5007_v42 }
 0x216   :  { %3494 = vmatprep.subr.bf16.mxu0 %v5012_v44 }
 0x219   :  { %3495 = vmatpush2.bf16.msra.mxu0 %v5010_v45 }
 0x21a   :  { %3496 = vmatprep.subr.bf16.mxu0 %v5015_v47  ;;  %v3270_v47 = vld [vmem:[%s6566_s6] sm:$0x3] }
 0x21b   :  { %v3279_v38 = vrot.slane %v3270_v47, %v6157_v58  ;;  %v5032_v58 = vld [vmem:[%s6569_s9 + $0x18] sm:$0xff]  }
 0x21d   :  { %3497 = vmatpush2.bf16.msra.mxu0 %v5013_v48  ;;  %v3275_v48 = vrot.slane %v3270_v47, %v6149_v56 }
 0x21e   :  { %4452 = vmatprep.subr.bf16.mxu0 %v5067_v36 }
 0x257   :  { %v3060_v55 = vpop.f32.mrf.mxu0 }
 0x258   :  { %v3061_v60 = vadd.f32 %v3060_v55, %v3020_v54 }
 0x259   :  { %v3062_v21 = vpop.f32.mrf.mxu0 }
 0x25a   :  { %v3063_v10 = vadd.f32 %v3062_v21, %v3022_v7  ;;  %v4270_v7 = vld [vmem:[%s6568_s8] ss:$0 sm:$0xff] }
 0x25b   :  { %v3064_v62 = vpop.f32.mrf.mxu0 }
 0x25d   :  { %v3065_v0 = vpop.f32.mrf.mxu0 }
 0x277   :  { %v4399_v2 = vpop.f32.mrf.mxu0 }
 0x279   :  { %v4400_v52 = vpop.f32.mrf.mxu0 }
 0x27a   :  { %v4401_v4 = vadd.f32 %v4400_v52, %v4399_v2  ;;  %v5033_v52 = vld [vmem:[%s6569_s9 + $0x10] sm:$0xff]  }
 0x27b   :  { %v4402_v5 = vpop.f32.mrf.mxu0 }
 0x27c   :  { %v5035_v5 = vld [vmem:[%s6569_s9] sm:$0xff]  }
 0x27d   :  { %v4403_v6 = vpop.f32.mrf.mxu0 }
 0x27e   :  { %v5036_v6 = vld [vmem:[%s6571_s11 + $0x10] ss:$0 sps:$4 sm:$0x33]  }
 0x27f   :  { %v3802_v8 = vsel %vm3800_vm5, %v5036_v6, 0 }
 0x297   :  { %v3101_v9 = vpop.f32.mrf.mxu1 }
 0x298   :  { %v3102_v11 = vadd.f32 %v3101_v9, %v3061_v60  ;;  %v5031_v60 = vld [vmem:[%s6569_s9 + $0x20] ss:$0 sps:$4 sm:$0xff]  }
 0x299   :  { %v3103_v13 = vpop.f32.mrf.mxu1  ;;  %v3725_v56 = vsel %vm3723_vm4, %v5031_v60, 0 }
 0x29a   :  { %v3104_v14 = vadd.f32 %v3103_v13, %v3063_v10  ;;  %v3228_v59 = vmax.f32 %v3102_v11, 0.0 }
 0x29b   :  { %v3105_v63 = vpop.f32.mrf.mxu1 }
 0x29c   :  { %v3229_v43 = vmax.f32 %v3104_v14, 0.0  ;;  %v3231_v18 = vpack.c.bf16 %v3228_v59, %v3228_v59 }
 0x29d   :  { %v3106_v16 = vpop.f32.mrf.mxu1 }
 0x29e   :  { %v3232_v17 = vpack.c.bf16 %v3229_v43, %v3229_v43  ;;  %v5037_v43 = vld [vmem:[%s6571_s11 + $0x8] sm:$0xff]   ;;  %v5038_v16 = vld [vmem:[%s6571_s11] sm:$0xff]  }
 0x2a0   :  { %3498 = vmatprep.mubr.bf16.mxu0 %v3232_v17  ;;  %v4281_v17 = vld [vmem:[%s6570_s10] ss:$0 sm:$0xff] }
 0x2a1   :  { %3499 = vmatmul.mubr.bf16.vlgmr.msra.gmra.mxu0 %v3231_v18 }
 0x2a2   :  { %4458 = vmatprep.mubr.msk.bf16.mxu0 %vm5068_vm1, %v5067_v36  ;;  %4453 = vmatpush3.bf16.msra.mxu0 %v3802_v8 }
 0x2a3   :  { %4454 = vmatprep.subr.bf16.mxu0 %v5067_v36 }
 0x2a6   :  { %4455 = vmatpush3.bf16.msra.mxu0 %v5037_v43 }
 0x2a7   :  { %4456 = vmatprep.subr.bf16.mxu0 %v5067_v36 }
 0x2aa   :  { %4457 = vmatpush3.bf16.msra.mxu0 %v5038_v16 }
 0x2b7   :  { %v4377_v61 = vpop.f32.mrf.mxu1 }
 0x2b9   :  { %v4378_v1 = vpop.f32.mrf.mxu1 }
 0x2ba   :  { %v4379_v22 = vadd.f32 %v4378_v1, %v4377_v61 }
 0x2bb   :  { %v4380_v19 = vpop.f32.mrf.mxu1 }
 0x2bc   :  { %v3143_v23 = vadd.f32 %v4379_v22, %v2401_v20 }
 0x2bd   :  { %v4381_v25 = vpop.f32.mrf.mxu1 }
 0x2be   :  { %v3183_v12 = vadd.f32 %v4401_v4, %v3143_v23  ;;  %v5034_v4 = vld [vmem:[%s6569_s9 + $0x8] sm:$0xff]  }
 0x2c7   :  { %v3222_v15 = vpop.f32.mrf.mxu1 }
 0x2c8   :  { %v3223_v27 = vadd.f32 %v3222_v15, %v3183_v12 }
 0x2c9   :  { %v4436_v28 = vpop.f32.mrf.mxu1 }
 0x2ca   :  { %v3230_v29 = vmax.f32 %v3223_v27, 0.0 }
 0x2cb   :  { %v3225_v30 = vpop.f32.mrf.mxu1 }
 0x2cc   :  { %v3233_v31 = vpack.c.bf16 %v3230_v29, %v3230_v29 }
 0x2cd   :  { %v4437_v32 = vpop.f32.mrf.mxu1 }
 0x2ce   :  { %4269 = vmatmul.mubr.msk.bf16.vlgmr.msra.gmra.mxu1 %vm3462_vm3, %v3233_v31 }
 0x2cf   :  { %3635 = vmatpush1.bf16.msra.mxu1 %v5022_v33 }
 0x2d0   :  { %3636 = vmatprep.subr.bf16.mxu1 %v5066_v35 }
 0x2d3   :  { %3637 = vmatpush1.bf16.msra.mxu1 %v5023_v46 }
 0x2d4   :  { %3638 = vmatprep.subr.bf16.mxu1 %v5066_v35 }
 0x2d7   :  { %3639 = vmatpush1.bf16.msra.mxu1 %v5024_v37 }
 0x2d8   :  { %3640 = vmatprep.subr.bf16.mxu1 %v5066_v35 }
 0x2db   :  { %3641 = vmatpush1.bf16.msra.mxu1 %v5025_v34 }
 0x2dc   :  { %3642 = vmatprep.subr.bf16.mxu1 %v5066_v35 }
 0x2df   :  { %3643 = vmatpush1.bf16.msra.mxu1 %v5026_v39 }
 0x2e0   :  { %3644 = vmatprep.subr.bf16.mxu1 %v5066_v35 }
 0x2e3   :  { %3645 = vmatpush1.bf16.msra.mxu1 %v5027_v24 }
 0x2e4   :  { %3646 = vmatprep.subr.bf16.mxu1 %v5066_v35 }
 0x2e7   :  { %3647 = vmatpush1.bf16.msra.mxu1 %v5028_v26 }
 0x2e8   :  { %3648 = vmatprep.subr.bf16.mxu1 %v5066_v35 }
 0x2eb   :  { %3649 = vmatpush1.bf16.msra.mxu1 %v5029_v40 }
 0x2ec   :  { %3664 = vmatprep.subr.bf16.mxu1 %v5066_v35 }
 0x2ef   :  { %3665 = vmatpush2.bf16.msra.mxu1 %v5030_v3 }
 0x2f0   :  { %4438 = vmatprep.subr.bf16.mxu1 %v5067_v36 }
 0x361   :  { %v3500_v41 = vpop.f32.mrf.mxu0 }
 0x362   :  { %v3501_v35 = vadd.f32 %v3500_v41, %v3275_v48 }
 0x363   :  { %v3502_v42 = vpop.f32.mrf.mxu0 }
 0x364   :  { %v3503_v50 = vadd.f32 %v3502_v42, %v3279_v38 }
 0x365   :  { %v3504_v44 = vpop.f32.mrf.mxu0 }
 0x367   :  { %v3505_v45 = vpop.f32.mrf.mxu0 }
 0x38e   :  { %v3541_v49 = vpop.f32.mrf.mxu1 }
 0x38f   :  { %v3542_v51 = vadd.f32 %v3541_v49, %v3501_v35 }
 0x390   :  { %v3543_v57 = vpop.f32.mrf.mxu1 }
 0x391   :  { %v3544_v53 = vadd.f32 %v3543_v57, %v3503_v50  ;;  %v3548_v54 = vmax.f32 %v3542_v51, 0.0 }
 0x392   :  { %v3545_v55 = vpop.f32.mrf.mxu1 }
 0x393   :  { %v3549_v21 = vmax.f32 %v3544_v53, 0.0  ;;  %v3550_v2 = vpack.c.bf16 %v3548_v54, %v3548_v54 }
 0x394   :  { %v3546_v62 = vpop.f32.mrf.mxu1 }
 0x395   :  { %v3551_v0 = vpack.c.bf16 %v3549_v21, %v3549_v21 }
 0x397   :  { %4280 = vmatprep.mubr.msk.bf16.mxu1 %vm1742_vm0, %v3551_v0 }
 0x398   :  { %3667 = vmatmul.mubr.bf16.vlgmr.msra.gmra.mxu1 %v3550_v2 }
 0x399   :  { %4439 = vmatpush3.bf16.msra.mxu1 %v3725_v56  ;;  %4448 = vmatprep.mubr.msk.bf16.mxu1 %vm5068_vm1, %v5067_v36 }
 0x39a   :  { %4440 = vmatprep.subr.bf16.mxu1 %v5067_v36 }
 0x39d   :  { %4441 = vmatpush3.bf16.msra.mxu1 %v5032_v58 }
 0x39e   :  { %4442 = vmatprep.subr.bf16.mxu1 %v5067_v36 }
 0x3a1   :  { %4443 = vmatpush3.bf16.msra.mxu1 %v5033_v52 }
 0x3a2   :  { %4444 = vmatprep.subr.bf16.mxu1 %v5067_v36 }
 0x3a5   :  { %4445 = vmatpush3.bf16.msra.mxu1 %v5034_v4 }
 0x3a6   :  { %4446 = vmatprep.subr.bf16.mxu1 %v5067_v36  ;;  %v4288_v36 = vld [vmem:[%s6572_s12] ss:$0 sm:$0xff] }
 0x3a9   :  { %4447 = vmatpush3.bf16.msra.mxu1 %v5035_v5 }
 0x458   :  { %v3668_v9 = vpop.f32.mrf.mxu1 }
 0x459   :  { %v3669_v10 = vadd.f32 %v4270_v7, %v3668_v9 }
 0x45a   :  { %v3670_v11 = vpop.f32.mrf.mxu1 }
 0x45b   :  { %v3674_v13 = vmax.f32 %v3669_v10, 0.0 }
 0x45c   :  { %v3671_v14 = vpop.f32.mrf.mxu1 }
 0x45d   :  { %v3675_v59 = vpack.c.bf16 %v3674_v13, %v3674_v13 }
 0x45e   :  { %v3672_v63 = vpop.f32.mrf.mxu1 }
 0x45f   :  { %4449 = vmatmul.mubr.msk.bf16.vlgmr.msra.gmra.mxu1 %vm3719_vm6, %v3675_v59 }
 0x51f   :  { %v3761_v18 = vpop.f32.mrf.mxu1 }
 0x520   :  { %v3762_v61 = vadd.f32 %v4281_v17, %v3761_v18 }
 0x521   :  { %v4450_v1 = vpop.f32.mrf.mxu1 }
 0x522   :  { %v3767_v19 = vmax.f32 %v3762_v61, 0.0 }
 0x523   :  { %v3764_v25 = vpop.f32.mrf.mxu1 }
 0x524   :  { %v3768_v20 = vpack.c.bf16 %v3767_v19, %v3767_v19 }
 0x525   :  { %v4451_v22 = vpop.f32.mrf.mxu1 }
 0x526   :  { %4459 = vmatmul.mubr.msk.bf16.vlgmr.msra.gmra.mxu0 %vm3796_vm7, %v3768_v20 }
 0x5e6   :  { %v3838_v23 = vpop.f32.mrf.mxu0 }
 0x5e7   :  { %v3839_v12 = vadd.f32 %v4288_v36, %v3838_v23 }
 0x5e8   :  { %v4460_v15 = vpop.f32.mrf.mxu0 }
 0x5e9   :  { %v3845_v27 = vsel %vm3844_vm8, %v3839_v12, -inf }
 0x5ea   :  { %3846 = vmax.xlane.f32.xlu0 %v3845_v27  ;;  %v3841_v28 = vpop.f32.mrf.mxu0 }
 0x5ec   :  { %v4461_v29 = vpop.f32.mrf.mxu0 }
 0x673   :  { %v3847_v30 = vpop.xlane.xlu0 %3846 }
 0x674   :  { %v3848_v31 = vsub.f32 %v3839_v12, %v3847_v30 }
 0x676   :  { %v3849_v32 = vmul.f32 1.442695, %v3848_v31 }
 0x678   :  { %5039 = vpow2.f32 %v3849_v32 }
 0x685   :  { %v5040_v33 = vpop.eup %5039 }
 0x686   :  { %v3851_v46 = vsel %vm3844_vm8, %v5040_v33, 0.0 }
 0x687   :  { %3852 = vadd.xlane.f32.xlu0 %v3851_v46 }
 0x710   :  { %v3853_v37 = vpop.xlane.xlu0 %3852 }
 0x711   :  { %5041 = vlog2.f32 %v3853_v37 }
 0x71e   :  { %v5042_v34 = vpop.eup %5041 }
 0x71f   :  { %v3855_v39 = vmul.f32 0.6931472, %v5042_v34 }
 0x721   :  { %v3856_v24 = vadd.f32 %v3855_v39, %v3847_v30 }
 0x723   :  { %v3857_v26 = vsub.f32 %v3839_v12, %v3856_v24 }
 0x725   :  { %3858 = vst.msk [vmem:[#allocation2] sm:$0xff] %vm3844_vm8, %v3857_v26 }
 0x726   :  { %3863 = vsyncadd [#allocation3], 96  ;;  %s5069_s10 = smov [#allocation2]  }
 0x727   :  { %s3864_s11 = sshll.u32 %s5069_s10, 4  ;;  %s3865_s11 = int_to_ptr.vmem [resolvable:$true] %s3864_s11 }
 0x728   :  { %s5043_s12 = scalar_lea.vmem %s3865_s11, 32  ;;  %s5047_s2 = scalar_lea.vmem %s3865_s11, 128 }
 0x729   :  { %p5044_p0 = scmp.ne.s32.totalorder %s3865_s11, %s5043_s12  ;;  %p5048_p1 = scmp.lt.s32.totalorder %s3865_s11, %s3865_s11 }
 0x72a   :  { %p5049_p2 = scmp.lt.s32.totalorder %s5047_s2, %s5043_s12 }
 0x72c   :  { %p5050_p3 = por %p5049_p2, %p5048_p1 }
 0x72e   :  { %p5051_p4 = pnand %p5050_p3, %p5044_p0 }
 0x730   :  { %5054 = shalt.err (!%p5051_p4)
}
 0x731   :  { %s5070_s1 = smov 32   ;;  %s5071_s29 = smov 2  }
 0x732   :  { %3870 = dma.vmem_to_hbm [thread:$0]  %s3865_s11, 32, %s6573_s13, [#allocation3], %s5070_s1, %s5070_s1, %s5071_s29  }
 0x733   :  { %5063 = dma.done.wait [#allocation3], 128  }
 0x734   :  { %5064 = vsyncadd [#allocation3], 4294967168 }
 0x735   :  { %3874 = vsyncpa [#allocation3], 1 }

</bundles_post_ra>
